<compile_context>
chip_gen: v7x
topology: tpu7x:2x2x1
jax: 0.10.0
libtpu: 0.0.40
codegen_flags: <defaults>
</compile_context>

<pallas_src>
import functools
import math

import jax
import jax.numpy as jnp
import numpy as np
from jax import lax
from jax.experimental import pallas as pl
from jax.experimental.pallas import tpu as pltpu


def _round_up(x, m):
    return ((x + m - 1) // m) * m


def _admm_kernel(params_ref, taps_ref,
                 b_ref, s_ref, ux_ref, uy_ref, uz_ref,
                 s_out, ux_out, uy_out, uz_out,
                 pad_ref, *, H, W, Cp, k, p, lpad, tpad, taps_reps, num_iters):
    WC = W * Cp
    kk = k * k
    row_w = pad_ref.shape[-1]           # lpad + WC + rpad
    rpad = row_w - lpad - WC

    rho_x = params_ref[0]
    rho_y = params_ref[1]
    rho_z = params_ref[2]
    lam = params_ref[3]                 # lambd / rho_z  (>= 0)
    inv_x_den = params_ref[4]           # 1 / (1 + rho_x)
    inv_rho_y = params_ref[5]           # 1 / rho_y
    inv_rho_z = params_ref[6]           # 1 / rho_z
    inv_s_den = params_ref[7]           # 1 / (rho_x + rho_y + rho_z + 1e-6)

    # ---- Hoisted per-tap lane weights: loaded once, reused by every conv of
    # every fused iteration.  taps_ref rows repeat every Cp lanes; broadcast
    # to the full W*Cp lane width in-register.
    def load_tap(t):
        w = taps_ref[t:t + 1, :]
        if taps_reps > 1:
            w = jnp.tile(w, (1, taps_reps))
        return w
    tap_w = [load_tap(t) for t in range(kk)]

    # ---- Zero only the halo of the padded scratch (each conv fully rewrites
    # the interior, so the halo stays zero for all convs of all iterations).
    # All four stores are lane-aligned / dense.
    pad_ref[tpad - p:tpad, :] = jnp.zeros((p, row_w), jnp.float32)
    pad_ref[tpad + H:tpad + H + p, :] = jnp.zeros((p, row_w), jnp.float32)
    pad_ref[tpad:tpad + H, 0:lpad] = jnp.zeros((H, lpad), jnp.float32)
    pad_ref[tpad:tpad + H, lpad + WC:row_w] = jnp.zeros((H, rpad), jnp.float32)

    def conv_same(img, flipped):
        # Depthwise zero-padded "same" correlation (PyTorch F.conv2d
        # semantics).  Interior store is a 128-lane-aligned dense vst.
        pad_ref[tpad:tpad + H, lpad:lpad + WC] = img
        out = None
        for i in range(k):
            rs = tpad - p + i
            for j in range(k):
                t = ((k - 1 - i) * k + (k - 1 - j)) if flipped else (i * k + j)
                cs = lpad + (j - p) * Cp
                term = tap_w[t] * pad_ref[rs:rs + H, cs:cs + WC]
                out = term if out is None else out + term
        return out

    b = b_ref[0]                        # loop-invariant, loaded once

    def iter_body(_, carry):
        s, u_x, u_y, u_z = carry
        # x-update
        Hs = conv_same(s, flipped=False)
        x = (b + rho_x * Hs - u_x) * inv_x_den
        # y-update (relu)
        y = jnp.maximum(s + u_y * inv_rho_y, 0.0)
        # z-update: soft threshold == t - clip(t, -lam, lam)  (lam >= 0)
        t = s + u_z * inv_rho_z
        z = t - jnp.minimum(jnp.maximum(t, -lam), lam)
        # reassociated partial duals: y, z, u_y, u_z die right after these
        a_y = rho_y * y - u_y
        a_z = rho_z * z - u_z
        # s-update (H^T via flipped psf)
        Ht_x = conv_same(x, flipped=True)
        s_new = (rho_x * Ht_x + a_y + a_z) * inv_s_den
        # dual updates
        Hs2 = conv_same(s_new, flipped=False)
        u_x_new = u_x + rho_x * (Hs2 - x)
        u_y_new = rho_y * s_new - a_y          # == u_y + rho_y*(s_new - y)
        u_z_new = rho_z * s_new - a_z          # == u_z + rho_z*(s_new - z)
        return s_new, u_x_new, u_y_new, u_z_new

    carry = (s_ref[0], ux_ref[0], uy_ref[0], uz_ref[0])
    if num_iters == 1:
        carry = iter_body(0, carry)
    else:
        # Fused ADMM iterations: state stays resident in VMEM, HBM is touched
        # only once on the way in and once on the way out.
        carry = lax.fori_loop(0, num_iters, iter_body, carry)

    s_out[0] = carry[0]
    ux_out[0] = carry[1]
    uy_out[0] = carry[2]
    uz_out[0] = carry[3]


def admm_block(b, s, u_x, u_y, u_z, psf,
               rho_x=1.0, rho_y=1.0, rho_z=1.0, lambd=0.1, num_iters=1):
    N, C, H, W = b.shape
    k = psf.shape[-1]
    assert psf.shape == (C, 1, k, k) and k % 2 == 1
    p = k // 2
    num_iters = int(num_iters)
    assert num_iters >= 1

    rho_x = float(rho_x)
    rho_y = float(rho_y)
    rho_z = float(rho_z)
    lambd = float(lambd)
    # Precomputed reciprocals / soft-threshold identity require these:
    assert rho_y > 0.0 and rho_z > 0.0 and lambd >= 0.0 and (1.0 + rho_x) != 0.0

    params = jnp.array([
        rho_x, rho_y, rho_z,
        lambd / rho_z,
        1.0 / (1.0 + rho_x),
        1.0 / rho_y,
        1.0 / rho_z,
        1.0 / (rho_x + rho_y + rho_z + 1e-6),
    ], jnp.float32)

    # Pad channels so the lane width W*Cp is a multiple of 128 -> dense,
    # unmasked output stores and an aligned pad-scratch interior.  Padded
    # channels carry zeros everywhere (depthwise conv never mixes channels).
    cm = 128 // math.gcd(W, 128)
    Cp = _round_up(C, cm)
    WC = W * Cp

    lpad = _round_up(max(p * Cp, 1), 128)     # left halo, 128-lane aligned
    rpad = lpad                               # right halo (>= p*Cp)
    tpad = _round_up(max(p, 1), 8)            # top halo, sublane aligned
    row_w = lpad + WC + rpad
    n_rows = tpad + H + p

    # Compact taps block: pattern repeats every Cp lanes; ship lcm(Cp,128)
    # lanes and broadcast to W*Cp in-kernel (no W-proportional redundant DMA).
    taps_T = (Cp * 128) // math.gcd(Cp, 128)
    assert WC % taps_T == 0
    taps_reps = WC // taps_T
    base = jnp.transpose(psf.reshape(C, k * k).astype(jnp.float32), (1, 0))
    base = jnp.pad(base, ((0, 0), (0, Cp - C)))          # (k*k, Cp)
    taps = jnp.tile(base, (1, taps_T // Cp))             # (k*k, taps_T)

    def to_lane(x):     # NCHW -> lane-dense (N, H, W*Cp)
        x = jnp.transpose(x.astype(jnp.float32), (0, 2, 3, 1))
        if Cp != C:
            x = jnp.pad(x, ((0, 0), (0, 0), (0, 0), (0, Cp - C)))
        return x.reshape(N, H, WC)

    def from_lane(x):   # (N, H, W*Cp) -> NCHW (drop padded channels)
        return jnp.transpose(x.reshape(N, H, W, Cp)[..., :C], (0, 3, 1, 2))

    img_spec = pl.BlockSpec((1, H, WC), lambda n: (n, 0, 0))
    taps_spec = pl.BlockSpec((k * k, taps_T), lambda n: (0, 0))
    smem_spec = pl.BlockSpec(memory_space=pltpu.MemorySpace.SMEM)
    out_sds = jax.ShapeDtypeStruct((N, H, WC), jnp.float32)

    # VMEM budget: 9 pipelined image blocks (double-buffered) + pad scratch +
    # headroom for in-kernel temporaries.  No extra 2x hedge; cap at ~7/8 of
    # the actual chip VMEM (v7x 64 MiB vs v5e/v6e 128 MiB).
    block_bytes = H * WC * 4
    pad_bytes = n_rows * row_w * 4
    est = 9 * 2 * block_bytes + 10 * block_bytes + pad_bytes + (1 << 20)
    try:
        vmem_cap = int(pltpu.get_tpu_info().vmem_capacity_bytes)
    except Exception:
        vmem_cap = 64 * 1024 * 1024
    vmem_limit = int(min(max(est, 32 * 1024 * 1024), (vmem_cap * 7) // 8))

    kernel = functools.partial(_admm_kernel, H=H, W=W, Cp=Cp, k=k, p=p,
                               lpad=lpad, tpad=tpad, taps_reps=taps_reps,
                               num_iters=num_iters)

    s_n, ux_n, uy_n, uz_n = pl.pallas_call(
        kernel,
        out_shape=(out_sds, out_sds, out_sds, out_sds),
        grid_spec=pltpu.PrefetchScalarGridSpec(
            num_scalar_prefetch=0,
            grid=(N,),
            in_specs=[smem_spec, taps_spec,
                      img_spec, img_spec, img_spec, img_spec, img_spec],
            out_specs=[img_spec, img_spec, img_spec, img_spec],
            scratch_shapes=[pltpu.VMEM((n_rows, row_w), jnp.float32)]),
        input_output_aliases={3: 0, 4: 1, 5: 2, 6: 3},
        compiler_params=pltpu.CompilerParams(
            dimension_semantics=("parallel",),
            vmem_limit_bytes=vmem_limit),
    )(params, taps, to_lane(b), to_lane(s), to_lane(u_x), to_lane(u_y),
      to_lane(u_z))

    return from_lane(s_n), from_lane(ux_n), from_lane(uy_n), from_lane(uz_n)


def _reference(b, s, u_x, u_y, u_z, psf, rho_x, rho_y, rho_z, lambd):
    """Pure-JAX reference mirroring the PyTorch forward (one ADMM step)."""
    C = b.shape[1]
    dn = ("NCHW", "OIHW", "NCHW")

    def conv(x, w):
        return jax.lax.conv_general_dilated(
            x, w, (1, 1), "SAME", dimension_numbers=dn, feature_group_count=C)

    Hs = conv(s, psf)
    x = (b + rho_x * Hs - u_x) / (1.0 + rho_x)
    y = jnp.maximum(s + u_y / rho_y, 0.0)
    t = s + u_z / rho_z
    lam = lambd / rho_z
    z = jnp.sign(t) * jnp.maximum(jnp.abs(t) - lam, 0.0)
    psf_t = jnp.flip(psf, axis=(2, 3))
    Ht_x = conv(x, psf_t)
    s_new = (rho_x * Ht_x + rho_y * y - u_y + rho_z * z - u_z) / (
        rho_x + rho_y + rho_z + 1e-6)
    Hs2 = conv(s_new, psf)
    u_x = u_x + rho_x * (Hs2 - x)
    u_y = u_y + rho_y * (s_new - y)
    u_z = u_z + rho_z * (s_new - z)
    return s_new, u_x, u_y, u_z


if __name__ == "__main__":
    N, C, H, W = 2, 4, 16, 16
    psf_size = 3

    key = jax.random.PRNGKey(0)
    kb, ks, kx, ky, kz, kp = jax.random.split(key, 6)
    b = jax.random.normal(kb, (N, C, H, W), jnp.float32)
    s = jax.random.normal(ks, (N, C, H, W), jnp.float32)
    u_x = 0.1 * jax.random.normal(kx, (N, C, H, W), jnp.float32)
    u_y = 0.1 * jax.random.normal(ky, (N, C, H, W), jnp.float32)
    u_z = 0.1 * jax.random.normal(kz, (N, C, H, W), jnp.float32)
    psf = jax.random.normal(kp, (C, 1, psf_size, psf_size), jnp.float32)

    # Parameters exactly as in ADMMBlock.__init__ (deterministic).
    rho_x, rho_y, rho_z, lambd = 1.0, 1.0, 1.0, 0.1

    fn = jax.jit(functools.partial(admm_block, rho_x=rho_x, rho_y=rho_y,
                                   rho_z=rho_z, lambd=lambd, num_iters=1))
    out = jax.block_until_ready(fn(b, s, u_x, u_y, u_z, psf))

    ref = _reference(b, s, u_x, u_y, u_z, psf, rho_x, rho_y, rho_z, lambd)
    for got, want in zip(out, ref):
        np.testing.assert_allclose(np.asarray(got), np.asarray(want),
                                   rtol=1e-4, atol=1e-4)

    print("KERNEL_OK")
</pallas_src>

<mosaic_0001>
module attributes {stable_mosaic.version = 11 : i64} {
  func.func @_admm_kernel(%arg0: i32, %arg1: memref<8xf32, #tpu.memory_space<smem>>, %arg2: memref<9x128xf32, #tpu.memory_space<vmem>>, %arg3: memref<1x16x128xf32, #tpu.memory_space<vmem>>, %arg4: memref<1x16x128xf32, #tpu.memory_space<vmem>>, %arg5: memref<1x16x128xf32, #tpu.memory_space<vmem>>, %arg6: memref<1x16x128xf32, #tpu.memory_space<vmem>>, %arg7: memref<1x16x128xf32, #tpu.memory_space<vmem>>, %arg8: memref<1x16x128xf32, #tpu.memory_space<vmem>>, %arg9: memref<1x16x128xf32, #tpu.memory_space<vmem>>, %arg10: memref<1x16x128xf32, #tpu.memory_space<vmem>>, %arg11: memref<1x16x128xf32, #tpu.memory_space<vmem>>, %arg12: memref<25x384xf32, #tpu.memory_space<vmem>>) attributes {dimension_semantics = [#tpu.dimension_semantics<parallel>], iteration_bounds = array<i64: 2>, scalar_prefetch = 0 : i64, scratch_operands = 1 : i64, tpu.core_type = #tpu.core_type<tc>, window_params = [{transform_indices = @transform_0, window_bounds = array<i64: 8>}, {pipeline_mode = #tpu.pipeline_mode<synchronous>, transform_indices = @transform_1, window_bounds = array<i64: 9, 128>}, {transform_indices = @transform_2, window_bounds = array<i64: 1, 16, 128>}, {transform_indices = @transform_3, window_bounds = array<i64: 1, 16, 128>}, {transform_indices = @transform_4, window_bounds = array<i64: 1, 16, 128>}, {transform_indices = @transform_5, window_bounds = array<i64: 1, 16, 128>}, {transform_indices = @transform_6, window_bounds = array<i64: 1, 16, 128>}, {transform_indices = @transform_7, window_bounds = array<i64: 1, 16, 128>}, {transform_indices = @transform_8, window_bounds = array<i64: 1, 16, 128>}, {transform_indices = @transform_9, window_bounds = array<i64: 1, 16, 128>}, {transform_indices = @transform_10, window_bounds = array<i64: 1, 16, 128>}]} {
    %c0 = arith.constant 0 : index
    %0 = memref.load %arg1[%c0] : memref<8xf32, #tpu.memory_space<smem>>
    %c1 = arith.constant 1 : index
    %1 = memref.load %arg1[%c1] : memref<8xf32, #tpu.memory_space<smem>>
    %c2 = arith.constant 2 : index
    %2 = memref.load %arg1[%c2] : memref<8xf32, #tpu.memory_space<smem>>
    %c3 = arith.constant 3 : index
    %3 = memref.load %arg1[%c3] : memref<8xf32, #tpu.memory_space<smem>>
    %c4 = arith.constant 4 : index
    %4 = memref.load %arg1[%c4] : memref<8xf32, #tpu.memory_space<smem>>
    %c5 = arith.constant 5 : index
    %5 = memref.load %arg1[%c5] : memref<8xf32, #tpu.memory_space<smem>>
    %c6 = arith.constant 6 : index
    %6 = memref.load %arg1[%c6] : memref<8xf32, #tpu.memory_space<smem>>
    %c7 = arith.constant 7 : index
    %7 = memref.load %arg1[%c7] : memref<8xf32, #tpu.memory_space<smem>>
    %c0_0 = arith.constant 0 : index
    %c0_1 = arith.constant 0 : index
    %8 = vector.load %arg2[%c0_0, %c0_1] : memref<9x128xf32, #tpu.memory_space<vmem>>, vector<1x128xf32>
    %c1_2 = arith.constant 1 : index
    %c0_3 = arith.constant 0 : index
    %9 = vector.load %arg2[%c1_2, %c0_3] : memref<9x128xf32, #tpu.memory_space<vmem>>, vector<1x128xf32>
    %c2_4 = arith.constant 2 : index
    %c0_5 = arith.constant 0 : index
    %10 = vector.load %arg2[%c2_4, %c0_5] : memref<9x128xf32, #tpu.memory_space<vmem>>, vector<1x128xf32>
    %c3_6 = arith.constant 3 : index
    %c0_7 = arith.constant 0 : index
    %11 = vector.load %arg2[%c3_6, %c0_7] : memref<9x128xf32, #tpu.memory_space<vmem>>, vector<1x128xf32>
    %c4_8 = arith.constant 4 : index
    %c0_9 = arith.constant 0 : index
    %12 = vector.load %arg2[%c4_8, %c0_9] : memref<9x128xf32, #tpu.memory_space<vmem>>, vector<1x128xf32>
    %c5_10 = arith.constant 5 : index
    %c0_11 = arith.constant 0 : index
    %13 = vector.load %arg2[%c5_10, %c0_11] : memref<9x128xf32, #tpu.memory_space<vmem>>, vector<1x128xf32>
    %c6_12 = arith.constant 6 : index
    %c0_13 = arith.constant 0 : index
    %14 = vector.load %arg2[%c6_12, %c0_13] : memref<9x128xf32, #tpu.memory_space<vmem>>, vector<1x128xf32>
    %c7_14 = arith.constant 7 : index
    %c0_15 = arith.constant 0 : index
    %15 = vector.load %arg2[%c7_14, %c0_15] : memref<9x128xf32, #tpu.memory_space<vmem>>, vector<1x128xf32>
    %c8 = arith.constant 8 : index
    %c0_16 = arith.constant 0 : index
    %16 = vector.load %arg2[%c8, %c0_16] : memref<9x128xf32, #tpu.memory_space<vmem>>, vector<1x128xf32>
    %cst = arith.constant 0.000000e+00 : f32
    %17 = vector.broadcast %cst : f32 to vector<1x384xf32>
    %c7_17 = arith.constant 7 : index
    %c0_18 = arith.constant 0 : index
    %18 = vector.load %arg12[%c7_17, %c0_18] : memref<25x384xf32, #tpu.memory_space<vmem>>, vector<1x384xf32>
    tpu.vector_store %arg12[%c7_17, %c0_18], %17 {strides = array<i32>} : memref<25x384xf32, #tpu.memory_space<vmem>>, vector<1x384xf32>,
    %cst_19 = arith.constant 0.000000e+00 : f32
    %19 = vector.broadcast %cst_19 : f32 to vector<1x384xf32>
    %c24 = arith.constant 24 : index
    %c0_20 = arith.constant 0 : index
    %20 = vector.load %arg12[%c24, %c0_20] : memref<25x384xf32, #tpu.memory_space<vmem>>, vector<1x384xf32>
    tpu.vector_store %arg12[%c24, %c0_20], %19 {strides = array<i32>} : memref<25x384xf32, #tpu.memory_space<vmem>>, vector<1x384xf32>,
    %cst_21 = arith.constant 0.000000e+00 : f32
    %21 = vector.broadcast %cst_21 : f32 to vector<16x128xf32>
    %c8_22 = arith.constant 8 : index
    %c0_23 = arith.constant 0 : index
    %22 = vector.load %arg12[%c8_22, %c0_23] : memref<25x384xf32, #tpu.memory_space<vmem>>, vector<16x128xf32>
    tpu.vector_store %arg12[%c8_22, %c0_23], %21 {strides = array<i32>} : memref<25x384xf32, #tpu.memory_space<vmem>>, vector<16x128xf32>,
    %cst_24 = arith.constant 0.000000e+00 : f32
    %23 = vector.broadcast %cst_24 : f32 to vector<16x128xf32>
    %c8_25 = arith.constant 8 : index
    %c256 = arith.constant 256 : index
    %24 = vector.load %arg12[%c8_25, %c256] : memref<25x384xf32, #tpu.memory_space<vmem>>, vector<16x128xf32>
    tpu.vector_store %arg12[%c8_25, %c256], %23 {strides = array<i32>} : memref<25x384xf32, #tpu.memory_space<vmem>>, vector<16x128xf32>,
    %c0_26 = arith.constant 0 : index
    %c0_27 = arith.constant 0 : index
    %c0_28 = arith.constant 0 : index
    %25 = vector.load %arg3[%c0_26, %c0_27, %c0_28] : memref<1x16x128xf32, #tpu.memory_space<vmem>>, vector<1x16x128xf32>
    %26 = vector.shape_cast %25 : vector<1x16x128xf32> to vector<16x128xf32>
    %c0_29 = arith.constant 0 : index
    %c0_30 = arith.constant 0 : index
    %c0_31 = arith.constant 0 : index
    %27 = vector.load %arg4[%c0_29, %c0_30, %c0_31] : memref<1x16x128xf32, #tpu.memory_space<vmem>>, vector<1x16x128xf32>
    %28 = vector.shape_cast %27 : vector<1x16x128xf32> to vector<16x128xf32>
    %c0_32 = arith.constant 0 : index
    %c0_33 = arith.constant 0 : index
    %c0_34 = arith.constant 0 : index
    %29 = vector.load %arg5[%c0_32, %c0_33, %c0_34] : memref<1x16x128xf32, #tpu.memory_space<vmem>>, vector<1x16x128xf32>
    %30 = vector.shape_cast %29 : vector<1x16x128xf32> to vector<16x128xf32>
    %c0_35 = arith.constant 0 : index
    %c0_36 = arith.constant 0 : index
    %c0_37 = arith.constant 0 : index
    %31 = vector.load %arg6[%c0_35, %c0_36, %c0_37] : memref<1x16x128xf32, #tpu.memory_space<vmem>>, vector<1x16x128xf32>
    %32 = vector.shape_cast %31 : vector<1x16x128xf32> to vector<16x128xf32>
    %c0_38 = arith.constant 0 : index
    %c0_39 = arith.constant 0 : index
    %c0_40 = arith.constant 0 : index
    %33 = vector.load %arg7[%c0_38, %c0_39, %c0_40] : memref<1x16x128xf32, #tpu.memory_space<vmem>>, vector<1x16x128xf32>
    %34 = vector.shape_cast %33 : vector<1x16x128xf32> to vector<16x128xf32>
    %c8_41 = arith.constant 8 : index
    %c128 = arith.constant 128 : index
    %35 = vector.load %arg12[%c8_41, %c128] : memref<25x384xf32, #tpu.memory_space<vmem>>, vector<16x128xf32>
    tpu.vector_store %arg12[%c8_41, %c128], %28 {strides = array<i32>} : memref<25x384xf32, #tpu.memory_space<vmem>>, vector<16x128xf32>,
    %c7_42 = arith.constant 7 : index
    %c120 = arith.constant 120 : index
    %36 = vector.load %arg12[%c7_42, %c120] : memref<25x384xf32, #tpu.memory_space<vmem>>, vector<16x128xf32>
    %37 = vector.broadcast %8 : vector<1x128xf32> to vector<16x128xf32>
    %38 = arith.mulf %37, %36 : vector<16x128xf32>
    %c7_43 = arith.constant 7 : index
    %c128_44 = arith.constant 128 : index
    %39 = vector.load %arg12[%c7_43, %c128_44] : memref<25x384xf32, #tpu.memory_space<vmem>>, vector<16x128xf32>
    %40 = vector.broadcast %9 : vector<1x128xf32> to vector<16x128xf32>
    %41 = arith.mulf %40, %39 : vector<16x128xf32>
    %42 = arith.addf %38, %41 : vector<16x128xf32>
    %c7_45 = arith.constant 7 : index
    %c136 = arith.constant 136 : index
    %43 = vector.load %arg12[%c7_45, %c136] : memref<25x384xf32, #tpu.memory_space<vmem>>, vector<16x128xf32>
    %44 = vector.broadcast %10 : vector<1x128xf32> to vector<16x128xf32>
    %45 = arith.mulf %44, %43 : vector<16x128xf32>
    %46 = arith.addf %42, %45 : vector<16x128xf32>
    %c8_46 = arith.constant 8 : index
    %c120_47 = arith.constant 120 : index
    %47 = vector.load %arg12[%c8_46, %c120_47] : memref<25x384xf32, #tpu.memory_space<vmem>>, vector<16x128xf32>
    %48 = vector.broadcast %11 : vector<1x128xf32> to vector<16x128xf32>
    %49 = arith.mulf %48, %47 : vector<16x128xf32>
    %50 = arith.addf %46, %49 : vector<16x128xf32>
    %c8_48 = arith.constant 8 : index
    %c128_49 = arith.constant 128 : index
    %51 = vector.load %arg12[%c8_48, %c128_49] : memref<25x384xf32, #tpu.memory_space<vmem>>, vector<16x128xf32>
    %52 = vector.broadcast %12 : vector<1x128xf32> to vector<16x128xf32>
    %53 = arith.mulf %52, %51 : vector<16x128xf32>
    %54 = arith.addf %50, %53 : vector<16x128xf32>
    %c8_50 = arith.constant 8 : index
    %c136_51 = arith.constant 136 : index
    %55 = vector.load %arg12[%c8_50, %c136_51] : memref<25x384xf32, #tpu.memory_space<vmem>>, vector<16x128xf32>
    %56 = vector.broadcast %13 : vector<1x128xf32> to vector<16x128xf32>
    %57 = arith.mulf %56, %55 : vector<16x128xf32>
    %58 = arith.addf %54, %57 : vector<16x128xf32>
    %c9 = arith.constant 9 : index
    %c120_52 = arith.constant 120 : index
    %59 = vector.load %arg12[%c9, %c120_52] : memref<25x384xf32, #tpu.memory_space<vmem>>, vector<16x128xf32>
    %60 = vector.broadcast %14 : vector<1x128xf32> to vector<16x128xf32>
    %61 = arith.mulf %60, %59 : vector<16x128xf32>
    %62 = arith.addf %58, %61 : vector<16x128xf32>
    %c9_53 = arith.constant 9 : index
    %c128_54 = arith.constant 128 : index
    %63 = vector.load %arg12[%c9_53, %c128_54] : memref<25x384xf32, #tpu.memory_space<vmem>>, vector<16x128xf32>
    %64 = vector.broadcast %15 : vector<1x128xf32> to vector<16x128xf32>
    %65 = arith.mulf %64, %63 : vector<16x128xf32>
    %66 = arith.addf %62, %65 : vector<16x128xf32>
    %c9_55 = arith.constant 9 : index
    %c136_56 = arith.constant 136 : index
    %67 = vector.load %arg12[%c9_55, %c136_56] : memref<25x384xf32, #tpu.memory_space<vmem>>, vector<16x128xf32>
    %68 = vector.broadcast %16 : vector<1x128xf32> to vector<16x128xf32>
    %69 = arith.mulf %68, %67 : vector<16x128xf32>
    %70 = arith.addf %66, %69 : vector<16x128xf32>
    %71 = vector.broadcast %0 : f32 to vector<16x128xf32>
    %72 = arith.mulf %71, %70 : vector<16x128xf32>
    %73 = arith.addf %26, %72 : vector<16x128xf32>
    %74 = arith.subf %73, %30 : vector<16x128xf32>
    %75 = vector.broadcast %4 : f32 to vector<16x128xf32>
    %76 = arith.mulf %74, %75 : vector<16x128xf32>
    %77 = vector.broadcast %5 : f32 to vector<16x128xf32>
    %78 = arith.mulf %32, %77 : vector<16x128xf32>
    %79 = arith.addf %28, %78 : vector<16x128xf32>
    %cst_57 = arith.constant 0.000000e+00 : f32
    %80 = vector.broadcast %cst_57 : f32 to vector<16x128xf32>
    %81 = arith.maximumf %79, %80 : vector<16x128xf32>
    %82 = vector.broadcast %6 : f32 to vector<16x128xf32>
    %83 = arith.mulf %34, %82 : vector<16x128xf32>
    %84 = arith.addf %28, %83 : vector<16x128xf32>
    %cst_58 = arith.constant 0.000000e+00 : f32
    %85 = arith.subf %cst_58, %3 : f32
    %86 = vector.broadcast %85 : f32 to vector<16x128xf32>
    %87 = arith.maximumf %84, %86 : vector<16x128xf32>
    %88 = vector.broadcast %3 : f32 to vector<16x128xf32>
    %89 = arith.minimumf %87, %88 : vector<16x128xf32>
    %90 = arith.subf %84, %89 : vector<16x128xf32>
    %91 = vector.broadcast %1 : f32 to vector<16x128xf32>
    %92 = arith.mulf %91, %81 : vector<16x128xf32>
    %93 = arith.subf %92, %32 : vector<16x128xf32>
    %94 = vector.broadcast %2 : f32 to vector<16x128xf32>
    %95 = arith.mulf %94, %90 : vector<16x128xf32>
    %96 = arith.subf %95, %34 : vector<16x128xf32>
    %c8_59 = arith.constant 8 : index
    %c128_60 = arith.constant 128 : index
    %97 = vector.load %arg12[%c8_59, %c128_60] : memref<25x384xf32, #tpu.memory_space<vmem>>, vector<16x128xf32>
    tpu.vector_store %arg12[%c8_59, %c128_60], %76 {strides = array<i32>} : memref<25x384xf32, #tpu.memory_space<vmem>>, vector<16x128xf32>,
    %c7_61 = arith.constant 7 : index
    %c120_62 = arith.constant 120 : index
    %98 = vector.load %arg12[%c7_61, %c120_62] : memref<25x384xf32, #tpu.memory_space<vmem>>, vector<16x128xf32>
    %99 = vector.broadcast %16 : vector<1x128xf32> to vector<16x128xf32>
    %100 = arith.mulf %99, %98 : vector<16x128xf32>
    %c7_63 = arith.constant 7 : index
    %c128_64 = arith.constant 128 : index
    %101 = vector.load %arg12[%c7_63, %c128_64] : memref<25x384xf32, #tpu.memory_space<vmem>>, vector<16x128xf32>
    %102 = vector.broadcast %15 : vector<1x128xf32> to vector<16x128xf32>
    %103 = arith.mulf %102, %101 : vector<16x128xf32>
    %104 = arith.addf %100, %103 : vector<16x128xf32>
    %c7_65 = arith.constant 7 : index
    %c136_66 = arith.constant 136 : index
    %105 = vector.load %arg12[%c7_65, %c136_66] : memref<25x384xf32, #tpu.memory_space<vmem>>, vector<16x128xf32>
    %106 = vector.broadcast %14 : vector<1x128xf32> to vector<16x128xf32>
    %107 = arith.mulf %106, %105 : vector<16x128xf32>
    %108 = arith.addf %104, %107 : vector<16x128xf32>
    %c8_67 = arith.constant 8 : index
    %c120_68 = arith.constant 120 : index
    %109 = vector.load %arg12[%c8_67, %c120_68] : memref<25x384xf32, #tpu.memory_space<vmem>>, vector<16x128xf32>
    %110 = vector.broadcast %13 : vector<1x128xf32> to vector<16x128xf32>
    %111 = arith.mulf %110, %109 : vector<16x128xf32>
    %112 = arith.addf %108, %111 : vector<16x128xf32>
    %c8_69 = arith.constant 8 : index
    %c128_70 = arith.constant 128 : index
    %113 = vector.load %arg12[%c8_69, %c128_70] : memref<25x384xf32, #tpu.memory_space<vmem>>, vector<16x128xf32>
    %114 = vector.broadcast %12 : vector<1x128xf32> to vector<16x128xf32>
    %115 = arith.mulf %114, %113 : vector<16x128xf32>
    %116 = arith.addf %112, %115 : vector<16x128xf32>
    %c8_71 = arith.constant 8 : index
    %c136_72 = arith.constant 136 : index
    %117 = vector.load %arg12[%c8_71, %c136_72] : memref<25x384xf32, #tpu.memory_space<vmem>>, vector<16x128xf32>
    %118 = vector.broadcast %11 : vector<1x128xf32> to vector<16x128xf32>
    %119 = arith.mulf %118, %117 : vector<16x128xf32>
    %120 = arith.addf %116, %119 : vector<16x128xf32>
    %c9_73 = arith.constant 9 : index
    %c120_74 = arith.constant 120 : index
    %121 = vector.load %arg12[%c9_73, %c120_74] : memref<25x384xf32, #tpu.memory_space<vmem>>, vector<16x128xf32>
    %122 = vector.broadcast %10 : vector<1x128xf32> to vector<16x128xf32>
    %123 = arith.mulf %122, %121 : vector<16x128xf32>
    %124 = arith.addf %120, %123 : vector<16x128xf32>
    %c9_75 = arith.constant 9 : index
    %c128_76 = arith.constant 128 : index
    %125 = vector.load %arg12[%c9_75, %c128_76] : memref<25x384xf32, #tpu.memory_space<vmem>>, vector<16x128xf32>
    %126 = vector.broadcast %9 : vector<1x128xf32> to vector<16x128xf32>
    %127 = arith.mulf %126, %125 : vector<16x128xf32>
    %128 = arith.addf %124, %127 : vector<16x128xf32>
    %c9_77 = arith.constant 9 : index
    %c136_78 = arith.constant 136 : index
    %129 = vector.load %arg12[%c9_77, %c136_78] : memref<25x384xf32, #tpu.memory_space<vmem>>, vector<16x128xf32>
    %130 = vector.broadcast %8 : vector<1x128xf32> to vector<16x128xf32>
    %131 = arith.mulf %130, %129 : vector<16x128xf32>
    %132 = arith.addf %128, %131 : vector<16x128xf32>
    %133 = vector.broadcast %0 : f32 to vector<16x128xf32>
    %134 = arith.mulf %133, %132 : vector<16x128xf32>
    %135 = arith.addf %134, %93 : vector<16x128xf32>
    %136 = arith.addf %135, %96 : vector<16x128xf32>
    %137 = vector.broadcast %7 : f32 to vector<16x128xf32>
    %138 = arith.mulf %136, %137 : vector<16x128xf32>
    %c8_79 = arith.constant 8 : index
    %c128_80 = arith.constant 128 : index
    %139 = vector.load %arg12[%c8_79, %c128_80] : memref<25x384xf32, #tpu.memory_space<vmem>>, vector<16x128xf32>
    tpu.vector_store %arg12[%c8_79, %c128_80], %138 {strides = array<i32>} : memref<25x384xf32, #tpu.memory_space<vmem>>, vector<16x128xf32>,
    %c7_81 = arith.constant 7 : index
    %c120_82 = arith.constant 120 : index
    %140 = vector.load %arg12[%c7_81, %c120_82] : memref<25x384xf32, #tpu.memory_space<vmem>>, vector<16x128xf32>
    %141 = vector.broadcast %8 : vector<1x128xf32> to vector<16x128xf32>
    %142 = arith.mulf %141, %140 : vector<16x128xf32>
    %c7_83 = arith.constant 7 : index
    %c128_84 = arith.constant 128 : index
    %143 = vector.load %arg12[%c7_83, %c128_84] : memref<25x384xf32, #tpu.memory_space<vmem>>, vector<16x128xf32>
    %144 = vector.broadcast %9 : vector<1x128xf32> to vector<16x128xf32>
    %145 = arith.mulf %144, %143 : vector<16x128xf32>
    %146 = arith.addf %142, %145 : vector<16x128xf32>
    %c7_85 = arith.constant 7 : index
    %c136_86 = arith.constant 136 : index
    %147 = vector.load %arg12[%c7_85, %c136_86] : memref<25x384xf32, #tpu.memory_space<vmem>>, vector<16x128xf32>
    %148 = vector.broadcast %10 : vector<1x128xf32> to vector<16x128xf32>
    %149 = arith.mulf %148, %147 : vector<16x128xf32>
    %150 = arith.addf %146, %149 : vector<16x128xf32>
    %c8_87 = arith.constant 8 : index
    %c120_88 = arith.constant 120 : index
    %151 = vector.load %arg12[%c8_87, %c120_88] : memref<25x384xf32, #tpu.memory_space<vmem>>, vector<16x128xf32>
    %152 = vector.broadcast %11 : vector<1x128xf32> to vector<16x128xf32>
    %153 = arith.mulf %152, %151 : vector<16x128xf32>
    %154 = arith.addf %150, %153 : vector<16x128xf32>
    %c8_89 = arith.constant 8 : index
    %c128_90 = arith.constant 128 : index
    %155 = vector.load %arg12[%c8_89, %c128_90] : memref<25x384xf32, #tpu.memory_space<vmem>>, vector<16x128xf32>
    %156 = vector.broadcast %12 : vector<1x128xf32> to vector<16x128xf32>
    %157 = arith.mulf %156, %155 : vector<16x128xf32>
    %158 = arith.addf %154, %157 : vector<16x128xf32>
    %c8_91 = arith.constant 8 : index
    %c136_92 = arith.constant 136 : index
    %159 = vector.load %arg12[%c8_91, %c136_92] : memref<25x384xf32, #tpu.memory_space<vmem>>, vector<16x128xf32>
    %160 = vector.broadcast %13 : vector<1x128xf32> to vector<16x128xf32>
    %161 = arith.mulf %160, %159 : vector<16x128xf32>
    %162 = arith.addf %158, %161 : vector<16x128xf32>
    %c9_93 = arith.constant 9 : index
    %c120_94 = arith.constant 120 : index
    %163 = vector.load %arg12[%c9_93, %c120_94] : memref<25x384xf32, #tpu.memory_space<vmem>>, vector<16x128xf32>
    %164 = vector.broadcast %14 : vector<1x128xf32> to vector<16x128xf32>
    %165 = arith.mulf %164, %163 : vector<16x128xf32>
    %166 = arith.addf %162, %165 : vector<16x128xf32>
    %c9_95 = arith.constant 9 : index
    %c128_96 = arith.constant 128 : index
    %167 = vector.load %arg12[%c9_95, %c128_96] : memref<25x384xf32, #tpu.memory_space<vmem>>, vector<16x128xf32>
    %168 = vector.broadcast %15 : vector<1x128xf32> to vector<16x128xf32>
    %169 = arith.mulf %168, %167 : vector<16x128xf32>
    %170 = arith.addf %166, %169 : vector<16x128xf32>
    %c9_97 = arith.constant 9 : index
    %c136_98 = arith.constant 136 : index
    %171 = vector.load %arg12[%c9_97, %c136_98] : memref<25x384xf32, #tpu.memory_space<vmem>>, vector<16x128xf32>
    %172 = vector.broadcast %16 : vector<1x128xf32> to vector<16x128xf32>
    %173 = arith.mulf %172, %171 : vector<16x128xf32>
    %174 = arith.addf %170, %173 : vector<16x128xf32>
    %175 = arith.subf %174, %76 : vector<16x128xf32>
    %176 = vector.broadcast %0 : f32 to vector<16x128xf32>
    %177 = arith.mulf %176, %175 : vector<16x128xf32>
    %178 = arith.addf %30, %177 : vector<16x128xf32>
    %179 = vector.broadcast %1 : f32 to vector<16x128xf32>
    %180 = arith.mulf %179, %138 : vector<16x128xf32>
    %181 = arith.subf %180, %93 : vector<16x128xf32>
    %182 = vector.broadcast %2 : f32 to vector<16x128xf32>
    %183 = arith.mulf %182, %138 : vector<16x128xf32>
    %184 = arith.subf %183, %96 : vector<16x128xf32>
    %c0_99 = arith.constant 0 : index
    %c0_100 = arith.constant 0 : index
    %c0_101 = arith.constant 0 : index
    %185 = vector.load %arg8[%c0_99, %c0_100, %c0_101] : memref<1x16x128xf32, #tpu.memory_space<vmem>>, vector<1x16x128xf32>
    %186 = vector.shape_cast %185 : vector<1x16x128xf32> to vector<16x128xf32>
    %187 = vector.shape_cast %138 : vector<16x128xf32> to vector<1x16x128xf32>
    tpu.vector_store %arg8[%c0_99, %c0_100, %c0_101], %187 {strides = array<i32>} : memref<1x16x128xf32, #tpu.memory_space<vmem>>, vector<1x16x128xf32>,
    %c0_102 = arith.constant 0 : index
    %c0_103 = arith.constant 0 : index
    %c0_104 = arith.constant 0 : index
    %188 = vector.load %arg9[%c0_102, %c0_103, %c0_104] : memref<1x16x128xf32, #tpu.memory_space<vmem>>, vector<1x16x128xf32>
    %189 = vector.shape_cast %188 : vector<1x16x128xf32> to vector<16x128xf32>
    %190 = vector.shape_cast %178 : vector<16x128xf32> to vector<1x16x128xf32>
    tpu.vector_store %arg9[%c0_102, %c0_103, %c0_104], %190 {strides = array<i32>} : memref<1x16x128xf32, #tpu.memory_space<vmem>>, vector<1x16x128xf32>,
    %c0_105 = arith.constant 0 : index
    %c0_106 = arith.constant 0 : index
    %c0_107 = arith.constant 0 : index
    %191 = vector.load %arg10[%c0_105, %c0_106, %c0_107] : memref<1x16x128xf32, #tpu.memory_space<vmem>>, vector<1x16x128xf32>
    %192 = vector.shape_cast %191 : vector<1x16x128xf32> to vector<16x128xf32>
    %193 = vector.shape_cast %181 : vector<16x128xf32> to vector<1x16x128xf32>
    tpu.vector_store %arg10[%c0_105, %c0_106, %c0_107], %193 {strides = array<i32>} : memref<1x16x128xf32, #tpu.memory_space<vmem>>, vector<1x16x128xf32>,
    %c0_108 = arith.constant 0 : index
    %c0_109 = arith.constant 0 : index
    %c0_110 = arith.constant 0 : index
    %194 = vector.load %arg11[%c0_108, %c0_109, %c0_110] : memref<1x16x128xf32, #tpu.memory_space<vmem>>, vector<1x16x128xf32>
    %195 = vector.shape_cast %194 : vector<1x16x128xf32> to vector<16x128xf32>
    %196 = vector.shape_cast %184 : vector<16x128xf32> to vector<1x16x128xf32>
    tpu.vector_store %arg11[%c0_108, %c0_109, %c0_110], %196 {strides = array<i32>} : memref<1x16x128xf32, #tpu.memory_space<vmem>>, vector<1x16x128xf32>,
    return
  }
  func.func @transform_0(%arg0: i32) -> i32 {
    %c0_i32 = arith.constant 0 : i32
    %c0_i32_0 = arith.constant 0 : i32
    return %c0_i32 : i32
  }
  func.func @transform_1(%arg0: i32) -> (i32, i32) {
    %c0_i32 = arith.constant 0 : i32
    %c0_i32_0 = arith.constant 0 : i32
    %c0_i32_1 = arith.constant 0 : i32
    return %c0_i32, %c0_i32_0 : i32, i32
  }
  func.func @transform_2(%arg0: i32) -> (i32, i32, i32) {
    %c0_i32 = arith.constant 0 : i32
    %c0_i32_0 = arith.constant 0 : i32
    %c0_i32_1 = arith.constant 0 : i32
    return %arg0, %c0_i32, %c0_i32_0 : i32, i32, i32
  }
  func.func @transform_3(%arg0: i32) -> (i32, i32, i32) {
    %c0_i32 = arith.constant 0 : i32
    %c0_i32_0 = arith.constant 0 : i32
    %c0_i32_1 = arith.constant 0 : i32
    return %arg0, %c0_i32, %c0_i32_0 : i32, i32, i32
  }
  func.func @transform_4(%arg0: i32) -> (i32, i32, i32) {
    %c0_i32 = arith.constant 0 : i32
    %c0_i32_0 = arith.constant 0 : i32
    %c0_i32_1 = arith.constant 0 : i32
    return %arg0, %c0_i32, %c0_i32_0 : i32, i32, i32
  }
  func.func @transform_5(%arg0: i32) -> (i32, i32, i32) {
    %c0_i32 = arith.constant 0 : i32
    %c0_i32_0 = arith.constant 0 : i32
    %c0_i32_1 = arith.constant 0 : i32
    return %arg0, %c0_i32, %c0_i32_0 : i32, i32, i32
  }
  func.func @transform_6(%arg0: i32) -> (i32, i32, i32) {
    %c0_i32 = arith.constant 0 : i32
    %c0_i32_0 = arith.constant 0 : i32
    %c0_i32_1 = arith.constant 0 : i32
    return %arg0, %c0_i32, %c0_i32_0 : i32, i32, i32
  }
  func.func @transform_7(%arg0: i32) -> (i32, i32, i32) {
    %c0_i32 = arith.constant 0 : i32
    %c0_i32_0 = arith.constant 0 : i32
    %c0_i32_1 = arith.constant 0 : i32
    return %arg0, %c0_i32, %c0_i32_0 : i32, i32, i32
  }
  func.func @transform_8(%arg0: i32) -> (i32, i32, i32) {
    %c0_i32 = arith.constant 0 : i32
    %c0_i32_0 = arith.constant 0 : i32
    %c0_i32_1 = arith.constant 0 : i32
    return %arg0, %c0_i32, %c0_i32_0 : i32, i32, i32
  }
  func.func @transform_9(%arg0: i32) -> (i32, i32, i32) {
    %c0_i32 = arith.constant 0 : i32
    %c0_i32_0 = arith.constant 0 : i32
    %c0_i32_1 = arith.constant 0 : i32
    return %arg0, %c0_i32, %c0_i32_0 : i32, i32, i32
  }
  func.func @transform_10(%arg0: i32) -> (i32, i32, i32) {
    %c0_i32 = arith.constant 0 : i32
    %c0_i32_0 = arith.constant 0 : i32
    %c0_i32_1 = arith.constant 0 : i32
    return %arg0, %c0_i32, %c0_i32_0 : i32, i32, i32
  }
}

</mosaic_0001>

<bundles_post_ra>
// kernel: tile.9
= control target key start
LH: loop header
LB: loop body
LE: loop exit
PB: predicated region body
PF: predicated region fallthrough
CT: control target
= control target key end

     0   :  { %vm6_vm0 = vcmask 1043458   ;;  %s53_s10 = smov 3  ;;  %s56_s11 = smov 12  ;;  %vm10_vm1 = vcmask 1045508   ;;  %vm14_vm2 = vcmask 1047558   ;;  %vm16_vm3 = vcmask 64512   ;;  %s978_s0 = inlined_call_operand.vmem [shape: f32[9,16,8], index: 0, kind: input, shape index: {}]   ;;  %s979_s1 = inlined_call_operand.vmem [shape: f32[9,128], index: 1, kind: output, shape index: {}]  }
   0x1   :  { %v470_v0 = vld [vmem:[%s978_s0 + $0x8e] sm:$0x1]   ;;  %v464_v1 = vld [vmem:[%s978_s0 + $0x8f] sm:$0x1]   ;;  %s565_s12 = smov 112   ;;  %s566_s13 = smov 120  }
   0x2   :  { %76 = vrot.lane.b32.xlu1 %v470_v0, %s565_s12  ;;  %47 = vrot.lane.b32.xlu0 %v464_v1, %s566_s13  ;;  %v466_v2 = vld [vmem:[%s978_s0 + $0xe] ss:$16 sm:%s53_s10]   ;;  %s61_s16 = smov 48  ;;  %s66_s17 = smov 192  ;;  %vm43_vm4 = vcmask 1048512   ;;  %vm72_vm5 = vcmask 982912  }
   0x3   :  { %v467_v3 = vld [vmem:[%s978_s0 + $0xe] ss:$16 sm:%s56_s11]   ;;  %s24_s22 = smov 3  ;;  %s27_s23 = smov 12  ;;  %v476_v15 = vld [vmem:[%s978_s0 + $0x8d] sm:$0x1]  }
   0x4   :  { %v468_v4 = vld [vmem:[%s978_s0 + $0xe] ss:$16 sm:%s61_s16]   ;;  %v59_v5 = vsel %vm6_vm0, %v467_v3, %v466_v2  ;;  %v460_v7 = vld [vmem:[%s978_s0 + $0xf] ss:$16 sm:%s24_s22]   ;;  %s32_s28 = smov 48  ;;  %s37_s29 = smov 192 }
   0x5   :  { %v469_v6 = vld [vmem:[%s978_s0 + $0xe] ss:$16 sm:%s66_s17]   ;;  %v64_v8 = vsel %vm10_vm1, %v468_v4, %v59_v5  ;;  %v461_v9 = vld [vmem:[%s978_s0 + $0xf] ss:$16 sm:%s27_s23]   ;;  %s82_s5 = smov 3  ;;  %s85_s8 = smov 12 }
   0x6   :  { %v462_v10 = vld [vmem:[%s978_s0 + $0xf] ss:$16 sm:%s32_s28]   ;;  %v69_v11 = vsel %vm14_vm2, %v469_v6, %v64_v8  ;;  %v30_v12 = vsel %vm6_vm0, %v461_v9, %v460_v7  ;;  %s90_s9 = smov 48  ;;  %v472_v16 = vld [vmem:[%s978_s0 + $0xd] ss:$16 sm:%s82_s5]   ;;  %s95_s15 = smov 192 }
   0x7   :  { %v463_v13 = vld [vmem:[%s978_s0 + $0xf] ss:$16 sm:%s37_s29]   ;;  %70 = vrot.lane.b32.xlu1 %v69_v11, %s565_s12  ;;  %v35_v14 = vsel %vm10_vm1, %v462_v10, %v30_v12  ;;  %s111_s20 = smov 3  ;;  %s114_s21 = smov 12  ;;  %v482_v26 = vld [vmem:[%s978_s0 + $0x8c] sm:$0x1]  }
   0x8   :  { %v40_v17 = vsel %vm14_vm2, %v463_v13, %v35_v14  ;;  %v473_v18 = vld [vmem:[%s978_s0 + $0xd] ss:$16 sm:%s85_s8]   ;;  %s119_s23 = smov 48  ;;  %s124_s24 = smov 192  ;;  %v478_v23 = vld [vmem:[%s978_s0 + $0xc] ss:$16 sm:%s111_s20]  }
   0x9   :  { %v474_v19 = vld [vmem:[%s978_s0 + $0xd] ss:$16 sm:%s90_s9]   ;;  %41 = vrot.lane.b32.xlu0 %v40_v17, %s566_s13  ;;  %v88_v20 = vsel %vm6_vm0, %v473_v18, %v472_v16  ;;  %s140_s29 = smov 3  ;;  %s567_s30 = smov 104   ;;  %v488_v37 = vld [vmem:[%s978_s0 + $0x8b] sm:$0x1]  }
   0xa   :  { %v475_v21 = vld [vmem:[%s978_s0 + $0xd] ss:$16 sm:%s95_s15]   ;;  %v93_v22 = vsel %vm10_vm1, %v474_v19, %v88_v20  ;;  %v479_v24 = vld [vmem:[%s978_s0 + $0xc] ss:$16 sm:%s114_s21]   ;;  %s143_s6 = smov 12  ;;  %s148_s7 = smov 48 }
   0xb   :  { %105 = vrot.lane.b32.xlu1 %v476_v15, %s567_s30  ;;  %v98_v25 = vsel %vm14_vm2, %v475_v21, %v93_v22  ;;  %v117_v27 = vsel %vm6_vm0, %v479_v24, %v478_v23  ;;  %v480_v28 = vld [vmem:[%s978_s0 + $0xc] ss:$16 sm:%s119_s23]   ;;  %s153_s12 = smov 192  ;;  %s169_s16 = smov 3  ;;  %v494_v46 = vld [vmem:[%s978_s0 + $0x8a] sm:$0x1]  }
   0xc   :  { %v122_v29 = vsel %vm10_vm1, %v480_v28, %v117_v27  ;;  %v481_v30 = vld [vmem:[%s978_s0 + $0xc] ss:$16 sm:%s124_s24]   ;;  %v484_v31 = vld [vmem:[%s978_s0 + $0xb] ss:$16 sm:%s140_s29]   ;;  %s172_s17 = smov 12  ;;  %s177_s13 = smov 48 }
   0xd   :  { %99 = vrot.lane.b32.xlu0 %v98_v25, %s567_s30  ;;  %v485_v32 = vld [vmem:[%s978_s0 + $0xb] ss:$16 sm:%s143_s6]   ;;  %v127_v33 = vsel %vm14_vm2, %v481_v30, %v122_v29  ;;  %s568_s22 = smov 96   ;;  %s198_s27 = smov 3  ;;  %v500_v54 = vld [vmem:[%s978_s0 + $0x89] sm:$0x1]  }
   0xe   :  { %v146_v34 = vsel %vm6_vm0, %v485_v32, %v484_v31  ;;  %v486_v35 = vld [vmem:[%s978_s0 + $0xb] ss:$16 sm:%s148_s7]   ;;  %v490_v39 = vld [vmem:[%s978_s0 + $0xa] ss:$16 sm:%s169_s16]   ;;  %s182_s3 = smov 192  ;;  %s201_s4 = smov 12 }
   0xf   :  { %v487_v36 = vld [vmem:[%s978_s0 + $0xb] ss:$16 sm:%s153_s12]   ;;  %134 = vrot.lane.b32.xlu1 %v482_v26, %s568_s22  ;;  %v151_v38 = vsel %vm10_vm1, %v486_v35, %v146_v34  ;;  %s206_s5 = smov 48  ;;  %s227_s10 = smov 3  ;;  %v506_v62 = vld [vmem:[%s978_s0 + $0x88] sm:$0x1]  }
  0x10   :  { %v491_v40 = vld [vmem:[%s978_s0 + $0xa] ss:$16 sm:%s172_s17]   ;;  %v156_v43 = vsel %vm14_vm2, %v487_v36, %v151_v38  ;;  %v496_v44 = vld [vmem:[%s978_s0 + $0x9] ss:$16 sm:%s198_s27]   ;;  %s230_s11 = smov 12  ;;  %s569_s12 = smov 88  }
  0x11   :  { %v492_v41 = vld [vmem:[%s978_s0 + $0xa] ss:$16 sm:%s177_s13]   ;;  %128 = vrot.lane.b32.xlu0 %v127_v33, %s568_s22  ;;  %v175_v42 = vsel %vm6_vm0, %v491_v40, %v490_v39  ;;  %s211_s20 = smov 192  ;;  %s235_s24 = smov 48  ;;  %v512_v6 = vld [vmem:[%s978_s0 + $0x87] sm:$0x1]  }
  0x12   :  { %v497_v45 = vld [vmem:[%s978_s0 + $0x9] ss:$16 sm:%s201_s4]   ;;  %v180_v47 = vsel %vm10_vm1, %v492_v41, %v175_v42  ;;  %v493_v48 = vld [vmem:[%s978_s0 + $0xa] ss:$16 sm:%s182_s3]   ;;  %s256_s25 = smov 3  ;;  %s259_s26 = smov 12 }
  0x13   :  { %163 = vrot.lane.b32.xlu1 %v488_v37, %s569_s12  ;;  %v204_v49 = vsel %vm6_vm0, %v497_v45, %v496_v44  ;;  %v498_v50 = vld [vmem:[%s978_s0 + $0x9] ss:$16 sm:%s206_s5]   ;;  %v185_v53 = vsel %vm14_vm2, %v493_v48, %v180_v47  ;;  %s570_s27 = smov 80   ;;  %s240_s5 = smov 192  ;;  %v458_v9 = vld [vmem:[%s978_s0 + $0x80] sm:$0x1]  }
  0x14   :  { %v502_v51 = vld [vmem:[%s978_s0 + $0x8] ss:$16 sm:%s227_s10]   ;;  %v209_v55 = vsel %vm10_vm1, %v498_v50, %v204_v49  ;;  %v499_v56 = vld [vmem:[%s978_s0 + $0x9] ss:$16 sm:%s211_s20]   ;;  %s264_s10 = smov 48  ;;  %s571_s14 = smov 72  }
  0x15   :  { %157 = vrot.lane.b32.xlu0 %v156_v43, %s569_s12  ;;  %v503_v52 = vld [vmem:[%s978_s0 + $0x8] ss:$16 sm:%s230_s11]   ;;  %s285_s11 = smov 3  ;;  %v214_v61 = vsel %vm14_vm2, %v499_v56, %v209_v55  ;;  %s288_s12 = smov 12  ;;  %459 = vst.msk [vmem:[%s979_s1 + $0x8] sm:$0x1] %vm16_vm3, %v458_v9  }
  0x16   :  { %v233_v57 = vsel %vm6_vm0, %v503_v52, %v502_v51  ;;  %v504_v58 = vld [vmem:[%s978_s0 + $0x8] ss:$16 sm:%s235_s24]   ;;  %v508_v59 = vld [vmem:[%s978_s0 + $0x7] ss:$16 sm:%s256_s25]   ;;  %s269_s21 = smov 192  ;;  %s293_s25 = smov 48 }
  0x17   :  { %192 = vrot.lane.b32.xlu1 %v494_v46, %s570_s27  ;;  %v509_v60 = vld [vmem:[%s978_s0 + $0x7] ss:$16 sm:%s259_s26]   ;;  %v238_v63 = vsel %vm10_vm1, %v504_v58, %v233_v57  ;;  %s314_s26 = smov 3  ;;  %s317_s29 = smov 12  ;;  %v518_v15 = vld [vmem:[%s978_s0 + $0x86] sm:$0x1]  }
  0x18   :  { %v505_v0 = vld [vmem:[%s978_s0 + $0x8] ss:$16 sm:%s240_s5]   ;;  %v262_v1 = vsel %vm6_vm0, %v509_v60, %v508_v59  ;;  %v510_v2 = vld [vmem:[%s978_s0 + $0x7] ss:$16 sm:%s264_s10]   ;;  %s572_s30 = smov 64   ;;  %s298_s8 = smov 192 }
  0x19   :  { %186 = vrot.lane.b32.xlu0 %v185_v53, %s570_s27  ;;  %v514_v3 = vld [vmem:[%s978_s0 + $0x6] ss:$16 sm:%s285_s11]   ;;  %v243_v5 = vsel %vm14_vm2, %v505_v0, %v238_v63  ;;  %v267_v7 = vsel %vm10_vm1, %v510_v2, %v262_v1  ;;  %s322_s16 = smov 48  ;;  %s343_s17 = smov 3  ;;  %v524_v23 = vld [vmem:[%s978_s0 + $0x85] sm:$0x1]  }
  0x1a   :  { %v515_v4 = vld [vmem:[%s978_s0 + $0x6] ss:$16 sm:%s288_s12]   ;;  %v511_v8 = vld [vmem:[%s978_s0 + $0x7] ss:$16 sm:%s269_s21]   ;;  %s346_s18 = smov 12  ;;  %s573_s19 = smov 56  }
  0x1b   :  { %221 = vrot.lane.b32.xlu1 %v500_v54, %s571_s14  ;;  %v291_v10 = vsel %vm6_vm0, %v515_v4, %v514_v3  ;;  %v516_v11 = vld [vmem:[%s978_s0 + $0x6] ss:$16 sm:%s293_s25]   ;;  %v272_v14 = vsel %vm14_vm2, %v511_v8, %v267_v7  ;;  %s327_s25 = smov 192  ;;  %s351_s28 = smov 48  ;;  %v530_v35 = vld [vmem:[%s978_s0 + $0x84] sm:$0x1]  }
  0x1c   :  { %v520_v12 = vld [vmem:[%s978_s0 + $0x5] ss:$16 sm:%s314_s26]   ;;  %v296_v16 = vsel %vm10_vm1, %v516_v11, %v291_v10  ;;  %v517_v17 = vld [vmem:[%s978_s0 + $0x6] ss:$16 sm:%s298_s8]   ;;  %s356_s2 = smov 192  ;;  %s372_s3 = smov 3 }
  0x1d   :  { %215 = vrot.lane.b32.xlu0 %v214_v61, %s571_s14  ;;  %v521_v13 = vld [vmem:[%s978_s0 + $0x5] ss:$16 sm:%s317_s29]   ;;  %v301_v22 = vsel %vm14_vm2, %v517_v17, %v296_v16  ;;  %s375_s4 = smov 12  ;;  %s380_s5 = smov 48  ;;  %v536_v46 = vld [vmem:[%s978_s0 + $0x83] sm:$0x1]  }
  0x1e   :  { %v320_v18 = vsel %vm6_vm0, %v521_v13, %v520_v12  ;;  %v522_v19 = vld [vmem:[%s978_s0 + $0x5] ss:$16 sm:%s322_s16]   ;;  %v526_v20 = vld [vmem:[%s978_s0 + $0x4] ss:$16 sm:%s343_s17]   ;;  %s574_s6 = smov 48   ;;  %s2_s11 = smov 3 }
  0x1f   :  { %250 = vrot.lane.b32.xlu1 %v506_v62, %s572_s30  ;;  %v527_v21 = vld [vmem:[%s978_s0 + $0x4] ss:$16 sm:%s346_s18]   ;;  %v325_v24 = vsel %vm10_vm1, %v522_v19, %v320_v18  ;;  %s4_s12 = smov 12  ;;  %s8_s18 = smov 48  ;;  %v542_v56 = vld [vmem:[%s978_s0 + $0x82] sm:$0x1]  }
  0x20   :  { %v523_v25 = vld [vmem:[%s978_s0 + $0x5] ss:$16 sm:%s327_s25]   ;;  %v349_v26 = vsel %vm6_vm0, %v527_v21, %v526_v20  ;;  %v528_v27 = vld [vmem:[%s978_s0 + $0x4] ss:$16 sm:%s351_s28]   ;;  %s401_s22 = smov 3  ;;  %s12_s23 = smov 192 }
  0x21   :  { %244 = vrot.lane.b32.xlu0 %v243_v5, %s572_s30  ;;  %v532_v28 = vld [vmem:[%s978_s0 + $0x3] ss:$16 sm:%s372_s3]   ;;  %v330_v31 = vsel %vm14_vm2, %v523_v25, %v325_v24  ;;  %s404_s26 = smov 12  ;;  %v354_v36 = vsel %vm10_vm1, %v528_v27, %v349_v26  ;;  %s385_s7 = smov 192  ;;  %v548_v62 = vld [vmem:[%s978_s0 + $0x81] sm:$0x1]  }
  0x22   :  { %v529_v29 = vld [vmem:[%s978_s0 + $0x4] ss:$16 sm:%s356_s2]   ;;  %v533_v30 = vld [vmem:[%s978_s0 + $0x3] ss:$16 sm:%s375_s4]   ;;  %s575_s2 = smov 40   ;;  %s409_s15 = smov 48 }
  0x23   :  { %279 = vrot.lane.b32.xlu1 %v512_v6, %s573_s19  ;;  %v534_v32 = vld [vmem:[%s978_s0 + $0x3] ss:$16 sm:%s380_s5]   ;;  %v378_v39 = vsel %vm6_vm0, %v533_v30, %v532_v28  ;;  %s430_s16 = smov 3  ;;  %v359_v45 = vsel %vm14_vm2, %v529_v29, %v354_v36  ;;  %s433_s17 = smov 12  ;;  %vm101_vm6 = vcmask 917312   ;;  %vm130_vm7 = vcmask 851712  }
  0x24   :  { %v3_v33 = vld [vmem:[%s978_s0] ss:$16 sm:%s2_s11]   ;;  %v538_v40 = vld [vmem:[%s978_s0 + $0x2] ss:$16 sm:%s401_s22]   ;;  %s576_s20 = smov 32   ;;  %v383_v47 = vsel %vm10_vm1, %v534_v32, %v378_v39  ;;  %s577_s3 = smov 24  }
  0x25   :  { %273 = vrot.lane.b32.xlu0 %v272_v14, %s573_s19  ;;  %v5_v34 = vld [vmem:[%s978_s0] ss:$16 sm:%s4_s12]   ;;  %s443_s10 = smov 192  ;;  %s578_s11 = smov 16   ;;  %vm159_vm8 = vcmask 786112   ;;  %vm188_vm9 = vcmask 720512  }
  0x26   :  { %v7_v37 = vsel %vm6_vm0, %v5_v34, %v3_v33  ;;  %v9_v38 = vld [vmem:[%s978_s0] ss:$16 sm:%s8_s18]   ;;  %v539_v43 = vld [vmem:[%s978_s0 + $0x2] ss:$16 sm:%s404_s26]   ;;  %s414_s26 = smov 192  ;;  %vm217_vm10 = vcmask 654912  }
  0x27   :  { %308 = vrot.lane.b32.xlu1 %v518_v15, %s574_s6  ;;  %v11_v41 = vsel %vm10_vm1, %v9_v38, %v7_v37  ;;  %v13_v42 = vld [vmem:[%s978_s0] ss:$16 sm:%s12_s23]   ;;  %v407_v49 = vsel %vm6_vm0, %v539_v43, %v538_v40  ;;  %vm246_vm11 = vcmask 589312   ;;  %vm275_vm12 = vcmask 523712  }
  0x28   :  { %v15_v44 = vsel %vm14_vm2, %v13_v42, %v11_v41  ;;  %v535_v48 = vld [vmem:[%s978_s0 + $0x3] ss:$16 sm:%s385_s7]   ;;  %v540_v50 = vld [vmem:[%s978_s0 + $0x2] ss:$16 sm:%s409_s15]   ;;  %vm304_vm13 = vcmask 458112   ;;  %vm333_vm14 = vcmask 392512  }
  0x29   :  { %302 = vrot.lane.b32.xlu0 %v301_v22, %s574_s6  ;;  %17 = vst.msk [vmem:[%s979_s1] sm:$0xff] %vm16_vm3, %v15_v44   ;;  %v544_v51 = vld [vmem:[%s978_s0 + $0x1] ss:$16 sm:%s430_s16]   ;;  %v388_v53 = vsel %vm14_vm2, %v535_v48, %v383_v47  ;;  %v412_v54 = vsel %vm10_vm1, %v540_v50, %v407_v49  ;;  %vm362_vm15 = vcmask 326912  }
  0x2a   :  { %v545_v52 = vld [vmem:[%s978_s0 + $0x1] ss:$16 sm:%s433_s17]   ;;  %v541_v55 = vld [vmem:[%s978_s0 + $0x2] ss:$16 sm:%s414_s26]  }
  0x2b   :  { %337 = vrot.lane.b32.xlu1 %v524_v23, %s575_s2  ;;  %v436_v57 = vsel %vm6_vm0, %v545_v52, %v544_v51  ;;  %v417_v59 = vsel %vm14_vm2, %v541_v55, %v412_v54  ;;  %v547_v61 = vld [vmem:[%s978_s0 + $0x1] ss:$16 sm:%s443_s10]   ;;  %vm391_vm0 = vcmask 261312  }
  0x2d   :  { %331 = vrot.lane.b32.xlu0 %v330_v31, %s575_s2  ;;  %s438_s2 = smov 48 }
  0x2e   :  { %v546_v58 = vld [vmem:[%s978_s0 + $0x1] ss:$16 sm:%s438_s2]   ;;  %s579_s0 = smov 8  }
  0x2f   :  { %366 = vrot.lane.b32.xlu1 %v530_v35, %s576_s20  ;;  %v441_v60 = vsel %vm10_vm1, %v546_v58, %v436_v57  ;;  %vm420_vm1 = vcmask 195712  }
  0x30   :  { %v446_v63 = vsel %vm14_vm2, %v547_v61, %v441_v60  ;;  %vm449_vm2 = vcmask 130112  }
  0x31   :  { %360 = vrot.lane.b32.xlu0 %v359_v45, %s576_s20 }
  0x33   :  { %395 = vrot.lane.b32.xlu1 %v536_v46, %s577_s3 }
  0x35   :  { %389 = vrot.lane.b32.xlu0 %v388_v53, %s577_s3 }
  0x37   :  { %424 = vrot.lane.b32.xlu1 %v542_v56, %s578_s11 }
  0x39   :  { %418 = vrot.lane.b32.xlu0 %v417_v59, %s578_s11 }
  0x3b   :  { %453 = vrot.lane.b32.xlu1 %v548_v62, %s579_s0 }
  0x3d   :  { %447 = vrot.lane.b32.xlu0 %v446_v63, %s579_s0 }
  0x74   :  { %v77_v0 = vpop.permute.xlu1 %76   ;;  %v48_v1 = vpop.permute.xlu0 %47  }
  0x75   :  { %465 = vst.msk [vmem:[%s979_s1 + $0x8] sm:$0x1] %vm43_vm4, %v48_v1  }
  0x76   :  { %471 = vst.msk [vmem:[%s979_s1 + $0x8] sm:$0x1] %vm72_vm5, %v77_v0  }
  0x79   :  { %v71_v2 = vpop.permute.xlu1 %70  }
  0x7b   :  { %v42_v3 = vpop.permute.xlu0 %41  }
  0x7c   :  { %44 = vst.msk [vmem:[%s979_s1] sm:$0xff] %vm43_vm4, %v42_v3  }
  0x7d   :  { %73 = vst.msk [vmem:[%s979_s1] sm:$0xff] %vm72_vm5, %v71_v2   ;;  %v106_v4 = vpop.permute.xlu1 %105  }
  0x7e   :  { %477 = vst.msk [vmem:[%s979_s1 + $0x8] sm:$0x1] %vm101_vm6, %v106_v4  }
  0x7f   :  { %v100_v5 = vpop.permute.xlu0 %99  }
  0x80   :  { %102 = vst.msk [vmem:[%s979_s1] sm:$0xff] %vm101_vm6, %v100_v5  }
  0x81   :  { %v135_v6 = vpop.permute.xlu1 %134  }
  0x82   :  { %483 = vst.msk [vmem:[%s979_s1 + $0x8] sm:$0x1] %vm130_vm7, %v135_v6  }
  0x83   :  { %v129_v7 = vpop.permute.xlu0 %128  }
  0x84   :  { %131 = vst.msk [vmem:[%s979_s1] sm:$0xff] %vm130_vm7, %v129_v7  }
  0x85   :  { %v164_v8 = vpop.permute.xlu1 %163  }
  0x86   :  { %489 = vst.msk [vmem:[%s979_s1 + $0x8] sm:$0x1] %vm159_vm8, %v164_v8  }
  0x87   :  { %v158_v9 = vpop.permute.xlu0 %157  }
  0x88   :  { %160 = vst.msk [vmem:[%s979_s1] sm:$0xff] %vm159_vm8, %v158_v9  }
  0x89   :  { %v193_v10 = vpop.permute.xlu1 %192  }
  0x8a   :  { %495 = vst.msk [vmem:[%s979_s1 + $0x8] sm:$0x1] %vm188_vm9, %v193_v10  }
  0x8b   :  { %v187_v11 = vpop.permute.xlu0 %186  }
  0x8c   :  { %189 = vst.msk [vmem:[%s979_s1] sm:$0xff] %vm188_vm9, %v187_v11  }
  0x8d   :  { %v222_v12 = vpop.permute.xlu1 %221  }
  0x8e   :  { %501 = vst.msk [vmem:[%s979_s1 + $0x8] sm:$0x1] %vm217_vm10, %v222_v12  }
  0x8f   :  { %v216_v13 = vpop.permute.xlu0 %215  }
  0x90   :  { %218 = vst.msk [vmem:[%s979_s1] sm:$0xff] %vm217_vm10, %v216_v13  }
  0x91   :  { %v251_v14 = vpop.permute.xlu1 %250  }
  0x92   :  { %507 = vst.msk [vmem:[%s979_s1 + $0x8] sm:$0x1] %vm246_vm11, %v251_v14  }
  0x93   :  { %v245_v15 = vpop.permute.xlu0 %244  }
  0x94   :  { %247 = vst.msk [vmem:[%s979_s1] sm:$0xff] %vm246_vm11, %v245_v15  }
  0x95   :  { %v280_v16 = vpop.permute.xlu1 %279  }
  0x96   :  { %513 = vst.msk [vmem:[%s979_s1 + $0x8] sm:$0x1] %vm275_vm12, %v280_v16  }
  0x97   :  { %v274_v17 = vpop.permute.xlu0 %273  }
  0x98   :  { %276 = vst.msk [vmem:[%s979_s1] sm:$0xff] %vm275_vm12, %v274_v17  }
  0x99   :  { %v309_v18 = vpop.permute.xlu1 %308  }
  0x9a   :  { %519 = vst.msk [vmem:[%s979_s1 + $0x8] sm:$0x1] %vm304_vm13, %v309_v18  }
  0x9b   :  { %v303_v19 = vpop.permute.xlu0 %302  }
  0x9c   :  { %305 = vst.msk [vmem:[%s979_s1] sm:$0xff] %vm304_vm13, %v303_v19  }
  0x9d   :  { %v338_v20 = vpop.permute.xlu1 %337  }
  0x9e   :  { %525 = vst.msk [vmem:[%s979_s1 + $0x8] sm:$0x1] %vm333_vm14, %v338_v20  }
  0x9f   :  { %v332_v21 = vpop.permute.xlu0 %331  }
  0xa0   :  { %334 = vst.msk [vmem:[%s979_s1] sm:$0xff] %vm333_vm14, %v332_v21  }
  0xa1   :  { %v367_v22 = vpop.permute.xlu1 %366  }
  0xa2   :  { %531 = vst.msk [vmem:[%s979_s1 + $0x8] sm:$0x1] %vm362_vm15, %v367_v22  }
  0xa3   :  { %v361_v23 = vpop.permute.xlu0 %360  }
  0xa4   :  { %363 = vst.msk [vmem:[%s979_s1] sm:$0xff] %vm362_vm15, %v361_v23  }
  0xa5   :  { %v396_v24 = vpop.permute.xlu1 %395  }
  0xa6   :  { %537 = vst.msk [vmem:[%s979_s1 + $0x8] sm:$0x1] %vm391_vm0, %v396_v24  }
  0xa7   :  { %v390_v25 = vpop.permute.xlu0 %389  }
  0xa8   :  { %392 = vst.msk [vmem:[%s979_s1] sm:$0xff] %vm391_vm0, %v390_v25  }
  0xa9   :  { %v425_v26 = vpop.permute.xlu1 %424  }
  0xaa   :  { %543 = vst.msk [vmem:[%s979_s1 + $0x8] sm:$0x1] %vm420_vm1, %v425_v26  }
  0xab   :  { %v419_v27 = vpop.permute.xlu0 %418  }
  0xac   :  { %421 = vst.msk [vmem:[%s979_s1] sm:$0xff] %vm420_vm1, %v419_v27  }
  0xad   :  { %v454_v28 = vpop.permute.xlu1 %453  }
  0xae   :  { %549 = vst.msk [vmem:[%s979_s1 + $0x8] sm:$0x1] %vm449_vm2, %v454_v28  }
  0xaf   :  { %v448_v29 = vpop.permute.xlu0 %447  }
  0xb0   :  { %450 = vst.msk [vmem:[%s979_s1] sm:$0xff] %vm449_vm2, %v448_v29  }

// kernel: admm_block.1
= control target key start
LH: loop header
LB: loop body
LE: loop exit
PB: predicated region body
PF: predicated region fallthrough
CT: control target
= control target key end

     0   :  { %16 = vsyncpa [#allocation4], 0  ;;  %s1651_s13 = smov 0   ;;  %s2218_s0 = inlined_call_operand.vmem [shape: f32[8], index: 0, kind: input, shape index: {}]   ;;  %s2219_s1 = inlined_call_operand.vmem [shape: f32[9,128], index: 1, kind: input, shape index: {}]   ;;  %s2220_s2 = inlined_call_operand.vmem [shape: f32[2,16,128], index: 2, kind: input, shape index: {}]   ;;  %s2221_s3 = inlined_call_operand.vmem [shape: f32[2,16,128], index: 3, kind: input, shape index: {}, may-alias: {3,7}]   ;;  %s2222_s4 = inlined_call_operand.vmem [shape: f32[2,16,128], index: 4, kind: input, shape index: {}, may-alias: {4,8}]   ;;  %s2223_s5 = inlined_call_operand.vmem [shape: f32[2,16,128], index: 5, kind: input, shape index: {}, may-alias: {5,9}]   ;;  %s2224_s6 = inlined_call_operand.vmem [shape: f32[2,16,128], index: 6, kind: input, shape index: {}, may-alias: {6,10}]   ;;  %s2225_s7 = inlined_call_operand.vmem [shape: f32[2,16,128], index: 7, kind: output, shape index: {0}, may-alias: {3,7}]   ;;  %s2226_s8 = inlined_call_operand.vmem [shape: f32[2,16,128], index: 8, kind: output, shape index: {1}, may-alias: {4,8}]   ;;  %s2227_s9 = inlined_call_operand.vmem [shape: f32[2,16,128], index: 9, kind: output, shape index: {2}, may-alias: {5,9}]   ;;  %s2228_s10 = inlined_call_operand.vmem [shape: f32[2,16,128], index: 10, kind: output, shape index: {3}, may-alias: {6,10}]  }
   0x1 LB: > { %s1657_s14 = sadd.s32 4294967295, %s1590_s13   ;;  %p1448_p0 = scmp.ge.s32.totalorder %s1590_s13, 1  ;;  %s1590_s13 = sphi %s1651_s13, %s22_s13  }
   0x2   : > { %p303_p1 = scmp.lt.s32.totalorder %s1590_s13, 3  ;;  %s316_s17 = sshll.u32 %s2218_s0, 4  ;;  %s317_s17 = int_to_ptr.vmem [resolvable:$true] %s316_s17 }
   0x3   : > { %p1506_p3 = scmp.eq.s32.totalorder %s1657_s14, 0  ;;  %s1565_s19 = scalar_lea.vmem %s317_s17, 16 }
   0x4   : > { %p1664_p2 = pnand %p1448_p0, %p303_p1  ;;  %p1566_p6 = scmp.ne.s32.totalorder %s317_s17, %s1565_s19 }
   0x5   : > { %p1573_p10 = scmp.lt.s32.totalorder %s317_s17, %s317_s17  ;;  %p1574_p11 = scmp.lt.s32.totalorder %s1565_s19, %s1565_s19 }
   0x6   : > { %p1502_p4 = pneg %p1664_p2 }
   0x7   : > { %p1575_p12 = por %p1574_p11, %p1573_p10 }
   0x8   : > { %p1503_p5 = pnand %p1506_p3, %p1502_p4 }
   0xa   : > { %p1567_p7 = pneg %p1503_p5 }
   0xc   : > { %p1568_p8 = pnand %p1567_p7, %p1566_p6 }
   0xe   : > { %p1569_p9 = pneg %p1568_p8 }
  0x10   : > { %p1576_p13 = pnand %p1575_p12, %p1569_p9 }
  0x12   : > { %1579 = shalt.err (!%p1576_p13)
}
  0x13   : > { %s1592_s20 = smov [#allocation3]   ;;  %372 = sbr.rel (%p1664_p2) target bundleno = 523 (0x20b), region = 48 }
  0x14   : > { %1505 = dma.vmem_to_smem (!%p1503_p5), %s317_s17, 16, %s1592_s20, [#allocation4]  }
  0x1a   : > { %1585 = dma.done.wait (%p1506_p3), [#allocation4], 16  }
  0x1b   : > { %1587 = vsyncadd (%p1506_p3), [#allocation4], 4294967280 }
  0x1c   : > { %378 = sfence }
  0x1d   : > { %v508_v0 = vlaneseq  ;;  %v1593_v1 = vmov 0.0   ;;  %p446_p0 = scmp.lt.s32.totalorder %s1657_s14, 1  ;;  %vm550_vm1 = vcmask 1040384   ;;  %vm693_vm2 = vcmask 1046528   ;;  %s1594_s25 = smov 8  }
  0x1e   : > { %518 = vst [vmem:[#allocation2 + $0x18] sm:$0xff] %v1593_v1  ;;  %519 = vst [vmem:[#allocation2 + $0x30] sm:$0xff] %v1593_v1  ;;  %v1694_v2 = vrot.slane %v1593_v1, 7  ;;  %v1703_v11 = vrot.slane %v1593_v1, 1  ;;  %s1595_s26 = smov 120   ;;  %vm569_vm3 = vcmask 64512  }
  0x1f   : > { %520 = vst [vmem:[#allocation2 + $0x28] sm:$0xff] %v1593_v1  ;;  %521 = vst [vmem:[#allocation2 + $0x40] sm:$0xff] %v1593_v1  ;;  %vm510_vm0 = vcmp.lt.s32.totalorder %v508_v0, 384  ;;  %s2231_s14 = smov (!%p446_p0, %s1657_s14), 1  ;;  %vm618_vm4 = vcmask 982016   ;;  %s491_s27 = sld [smem:[#allocation3]] }
  0x20   : > { %513 = vst.msk [vmem:[#allocation2 + $0x7] ss:$8 sm:$0x7] %vm510_vm0, %v1593_v1  ;;  %516 = vst.msk [vmem:[#allocation2 + $0x48] ss:$8 sm:$0x7] %vm510_vm0, %v1593_v1 }
  0x21   : > { %s1687_s21 = sshll.u32 %s2231_s14, 4  ;;  %s1870_s30 = sld [smem:[#allocation3 + $0x4]] }
  0x22   : > { %s455_s24 = scalar_lea.vmem %s2221_s3, %s1687_s21  ;;  %s450_s14 = scalar_lea.vmem %s2220_s2, %s1687_s21 }
  0x23   : > { %v1696_v3 = vld [vmem:[%s455_s24] sm:$0xff]  ;;  %v1698_v4 = vld [vmem:[%s455_s24 + $0x8] sm:$0xff]  ;;  %s460_s17 = scalar_lea.vmem %s2222_s4, %s1687_s21  ;;  %s1969_s18 = sld [smem:[#allocation3 + $0x6]] }
  0x24   : > { %532 = vst [vmem:[#allocation2 + $0x20] sm:$0xff] %v1696_v3  ;;  %533 = vst [vmem:[#allocation2 + $0x38] sm:$0xff] %v1698_v4  ;;  %v555_v22 = vrot.slane %v1696_v3, 7  ;;  %v698_v34 = vrot.slane %v1698_v4, 1  ;;  %s1971_s19 = sld [smem:[#allocation3 + $0x3]]  ;;  %s470_s23 = scalar_lea.vmem %s2224_s6, %s1687_s21 }
  0x25   : > { %v538_v5 = vld [vmem:[#allocation2 + $0x30] sm:$0x7f]  ;;  %v681_v7 = vld [vmem:[#allocation2 + $0x18] sm:$0xfe]  ;;  %s1977_s24 = sld [smem:[#allocation3 + $0x5]]  ;;  %s465_s29 = scalar_lea.vmem %s2223_s5, %s1687_s21 }
  0x26   : > { %v597_v6 = vld [vmem:[#allocation2 + $0x40] sm:$0x7f]  ;;  %v557_v8 = vrot.slane %v538_v5, 7  ;;  %v694_v15 = vrot.slane %v681_v7, 1  ;;  %v739_v40 = vld [vmem:[#allocation2 + $0x28] sm:$0xfe]  ;;  %s485_s20 = scalar_lea.vmem %s2227_s9, %s1687_s21 }
  0x27   : > { %v608_v9 = vrot.slane %v597_v6, 7  ;;  %v534_v10 = vld [vmem:[#allocation2] sm:$0x80]  ;;  %v1710_v17 = vld [vmem:[#allocation2 + $0x8] sm:$0x80]  ;;  %v747_v42 = vrot.slane %v739_v40, 1 }
  0x28   : > { %v558_v12 = vsel %vm550_vm1, %v1694_v2, %v557_v8  ;;  %v551_v13 = vrot.slane %v534_v10, 7  ;;  %v696_v20 = vsel %vm693_vm2, %v694_v15, %v1703_v11  ;;  %v554_v21 = vrot.slane %v1710_v17, 7  ;;  %v595_v23 = vld [vmem:[#allocation2 + $0x10] sm:$0x80]  ;;  %v683_v32 = vld [vmem:[#allocation2 + $0x48] sm:$0x1] }
  0x29   : > { %v609_v14 = vsel %vm550_vm1, %v1694_v2, %v608_v9  ;;  %v1520_v16 = vpack.i.bf16 %v1593_v1, %v558_v12  ;;  %v1530_v24 = vpack.i.bf16 %v696_v20, %v1593_v1  ;;  %v605_v26 = vrot.slane %v595_v23, 7  ;;  %v1746_v36 = vld [vmem:[#allocation2 + $0x50] sm:$0x1]  ;;  %v740_v43 = vld [vmem:[#allocation2 + $0x58] sm:$0x1]  ;;  %s2016_s11 = sld [smem:[#allocation3 + $0x1]] }
  0x2a   : > { %v553_v18 = vsel %vm550_vm1, %v551_v13, %v1694_v2  ;;  %v1525_v19 = vpack.i.bf16 %v1593_v1, %v609_v14  ;;  %v556_v25 = vsel %vm550_vm1, %v554_v21, %v555_v22  ;;  %v700_v35 = vrot.slane %v683_v32, 1  ;;  %v811_v44 = vld [vmem:[#allocation2] sm:$0x80]  ;;  %v815_v45 = vld [vmem:[#allocation2 + $0x30] sm:$0x7f]  ;;  %s2028_s12 = sld [smem:[#allocation3 + $0x2]] }
  0x2b   : > { %1521 = vrot.lane.b32.xlu1 %v1520_v16, %s1594_s25  ;;  %561 = vrot.lane.b32.xlu0 %v553_v18, %s1594_s25  ;;  %v1726_v27 = vld [vmem:[#allocation2 + $0x38] sm:$0x7f]  ;;  %v607_v28 = vsel %vm550_vm1, %v605_v26, %v1694_v2  ;;  %v1738_v31 = vld [vmem:[#allocation2 + $0x20] sm:$0xfe]  ;;  %v702_v39 = vrot.slane %v1746_v36, 1  ;;  %v750_v46 = vrot.slane %v740_v43, 1  ;;  %v749_v47 = vsel %vm693_vm2, %v747_v42, %v1703_v11 }
  0x2c   : > { %v559_v29 = vrot.slane %v1726_v27, 7  ;;  %v697_v33 = vrot.slane %v1738_v31, 1  ;;  %v701_v38 = vsel %vm693_vm2, %v1703_v11, %v700_v35  ;;  %v823_v48 = vrot.slane %v811_v44, 7  ;;  %v862_v50 = vld [vmem:[#allocation2 + $0x10] sm:$0x80] }
  0x2d   : > { %v703_v41 = vsel %vm693_vm2, %v698_v34, %v702_v39  ;;  %v829_v49 = vrot.slane %v815_v45, 7  ;;  %v864_v51 = vld [vmem:[#allocation2 + $0x40] sm:$0x7f]  ;;  %v751_v52 = vsel %vm693_vm2, %v1703_v11, %v750_v46  ;;  %v868_v53 = vrot.slane %v862_v50, 7  ;;  %v931_v57 = vld [vmem:[#allocation2 + $0x18] sm:$0xfe] }
  0x2e   : > { %v560_v30 = vsel %vm550_vm1, %v555_v22, %v559_v29  ;;  %v699_v37 = vsel %vm693_vm2, %v697_v33, %v698_v34  ;;  %v825_v54 = vsel %vm550_vm1, %v823_v48, %v1694_v2  ;;  %v871_v55 = vrot.slane %v864_v51, 7  ;;  %v1789_v9 = vld [vmem:[%s2219_s1 + $0x1] ss:$0 sm:$0xff]  ;;  %v1800_v21 = vld [vmem:[%s2219_s1] ss:$0 sm:$0xff] }
  0x2f   : > { %1526 = vrot.lane.b32.xlu1 %v1525_v19, %s1595_s26  ;;  %637 = vrot.lane.b32.xlu0 %v1696_v3, %s1594_s25  ;;  %v830_v56 = vsel %vm550_vm1, %v1694_v2, %v829_v49  ;;  %v870_v59 = vsel %vm550_vm1, %v868_v53, %v1694_v2  ;;  %v939_v61 = vrot.slane %v931_v57, 1  ;;  %v580_v10 = vmul.f32 %v1789_v9, %v1710_v17  ;;  %v1819_v44 = vld [vmem:[%s2219_s1 + $0x3] ss:$0 sm:$0xff]  ;;  %v1827_v50 = vld [vmem:[%s2219_s1 + $0x4] ss:$0 sm:$0xff] }
  0x30   : > { %v1535_v58 = vpack.i.bf16 %v1593_v1, %v830_v56  ;;  %v872_v60 = vsel %vm550_vm1, %v1694_v2, %v871_v55  ;;  %v581_v13 = vmul.f32 %v1789_v9, %v1696_v3  ;;  %v582_v15 = vmul.f32 %v1789_v9, %v1726_v27  ;;  %v1832_v51 = vld [vmem:[%s2219_s1 + $0x7] ss:$0 sm:$0xff]  ;;  %v1839_v57 = vld [vmem:[%s2219_s1 + $0x5] ss:$0 sm:$0xff] }
  0x31   : > { %v1540_v62 = vpack.i.bf16 %v1593_v1, %v872_v60  ;;  %v941_v63 = vsel %vm693_vm2, %v939_v61, %v1703_v11  ;;  %v586_v16 = vrot.slane %v580_v10, 7  ;;  %v655_v60 = vmul.f32 %v1827_v50, %v1696_v3 }
  0x32   : > { %v1545_v0 = vpack.i.bf16 %v941_v63, %v1593_v1  ;;  %v587_v18 = vrot.slane %v581_v13, 7  ;;  %v589_v22 = vrot.slane %v582_v15, 7  ;;  %v724_v63 = vmul.f32 %v1832_v51, %v1738_v31 }
  0x33   : > { %1531 = vrot.lane.b32.xlu1 %v1530_v24, %s1594_s25  ;;  %563 = vrot.lane.b32.xlu0 %v556_v25, %s1594_s25  ;;  %v1806_v24 = vld [vmem:[%s2219_s1 + $0x2] ss:$0 sm:$0xff]  ;;  %v726_v31 = vmul.f32 %v1832_v51, %v1746_v36  ;;  %v1867_v36 = vld [vmem:[%s2219_s1 + $0x8] ss:$0 sm:$0xff] }
  0x34   : > { %v588_v26 = vsel %vm550_vm1, %v586_v16, %v587_v18  ;;  %v590_v33 = vsel %vm550_vm1, %v587_v18, %v589_v22  ;;  %v730_v16 = vrot.slane %v724_v63, 1 }
  0x37   : > { %612 = vrot.lane.b32.xlu1 %v607_v28, %s1595_s26  ;;  %610 = vrot.lane.b32.xlu0 %v556_v25, %s1595_s26 }
  0x3b   : > { %567 = vrot.lane.b32.xlu1 %v560_v30, %s1594_s25  ;;  %614 = vrot.lane.b32.xlu0 %v560_v30, %s1595_s26 }
  0x3f   : > { %665 = vrot.lane.b32.xlu1 %v1696_v3, %s1595_s26  ;;  %641 = vrot.lane.b32.xlu0 %v1698_v4, %s1594_s25 }
  0x43   : > { %671 = vrot.lane.b32.xlu1 %v1593_v1, %s1595_s26  ;;  %669 = vrot.lane.b32.xlu0 %v1698_v4, %s1595_s26 }
  0x47   : > { %706 = vrot.lane.b32.xlu0 %v699_v37, %s1594_s25  ;;  %708 = vrot.lane.b32.xlu1 %v701_v38, %s1594_s25 }
  0x4b   : > { %710 = vrot.lane.b32.xlu0 %v703_v41, %s1594_s25  ;;  %752 = vrot.lane.b32.xlu1 %v699_v37, %s1595_s26 }
  0x4f   : > { %754 = vrot.lane.b32.xlu0 %v749_v47, %s1595_s26  ;;  %756 = vrot.lane.b32.xlu1 %v703_v41, %s1595_s26 }
  0x53   : > { %758 = vrot.lane.b32.xlu0 %v751_v52, %s1595_s26  ;;  %833 = vrot.lane.b32.xlu1 %v825_v54, %s1594_s25 }
  0x57   : > { %875 = vrot.lane.b32.xlu0 %v870_v59, %s1595_s26  ;;  %1536 = vrot.lane.b32.xlu1 %v1535_v58, %s1594_s25 }
  0x5b   : > { %1541 = vrot.lane.b32.xlu0 %v1540_v62, %s1595_s26  ;;  %v1847_v62 = vld [vmem:[%s2219_s1 + $0x6] ss:$0 sm:$0xff] }
  0x5f   : > { %1546 = vrot.lane.b32.xlu0 %v1545_v0, %s1594_s25  ;;  %v725_v0 = vmul.f32 %v1832_v51, %v1698_v4 }
  0x61   : > { %v731_v18 = vrot.slane %v725_v0, 1 }
  0x9d   : > { %v1522_v5 = vpop.permute.xlu1 %1521  ;;  %v562_v6 = vpop.permute.xlu0 %561 }
  0x9e   : > { %v1523_v23 = vunpack.i.l.bf16 %v1522_v5  ;;  %v1524_v30 = vunpack.i.h.bf16 %v1522_v5 }
  0xa1   : > { %v1527_v7 = vpop.permute.xlu1 %1526  ;;  %v638_v8 = vpop.permute.xlu0 %637 }
  0xa2   : > { %v1528_v32 = vunpack.i.l.bf16 %v1527_v7  ;;  %v643_v45 = vsel %vm569_vm3, %v1524_v30, %v638_v8  ;;  %v1529_v49 = vunpack.i.h.bf16 %v1527_v7  ;;  %v656_v7 = vmul.f32 %v1827_v50, %v1698_v4 }
  0xa3   : > { %v647_v52 = vmul.f32 %v1819_v44, %v643_v45 }
  0xa5   : > { %v1532_v12 = vpop.permute.xlu1 %1531  ;;  %v564_v14 = vpop.permute.xlu0 %563 }
  0xa6   : > { %v570_v17 = vsel %vm569_vm3, %v562_v6, %v564_v14  ;;  %v1533_v38 = vunpack.i.l.bf16 %v1532_v12  ;;  %v1534_v61 = vunpack.i.h.bf16 %v1532_v12 }
  0xa7   : > { %v574_v27 = vmul.f32 %v1800_v21, %v570_v17 }
  0xa9   : > { %v613_v19 = vpop.permute.xlu1 %612  ;;  %v611_v20 = vpop.permute.xlu0 %610  ;;  %v593_v40 = vadd.f32 %v588_v26, %v574_v27 }
  0xaa   : > { %v619_v25 = vsel %vm618_vm4, %v611_v20, %v613_v19 }
  0xab   : > { %v623_v35 = vmul.f32 %v1806_v24, %v619_v25 }
  0xad   : > { %v568_v28 = vpop.permute.xlu1 %567  ;;  %v615_v29 = vpop.permute.xlu0 %614  ;;  %v625_v47 = vadd.f32 %v623_v35, %v593_v40 }
  0xae   : > { %v571_v34 = vsel %vm569_vm3, %v1523_v23, %v568_v28  ;;  %v620_v39 = vsel %vm618_vm4, %v615_v29, %v1528_v32  ;;  %v733_v28 = vrot.slane %v726_v31, 1  ;;  %v732_v29 = vsel %vm693_vm2, %v730_v16, %v731_v18  ;;  %v933_v31 = vld [vmem:[#allocation2 + $0x48] sm:$0x1] }
  0xaf   : > { %v575_v37 = vmul.f32 %v1800_v21, %v571_v34  ;;  %v624_v48 = vmul.f32 %v1806_v24, %v620_v39  ;;  %v649_v59 = vadd.f32 %v647_v52, %v625_v47  ;;  %v1878_v39 = vstv %s491_s27  ;;  %s480_s27 = scalar_lea.vmem %s2226_s8, %s1687_s21 }
  0xb0   : > { %v734_v40 = vsel %vm693_vm2, %v731_v18, %v733_v28  ;;  %v945_v18 = vrot.slane %v933_v31, 1 }
  0xb1   : > { %v594_v41 = vadd.f32 %v590_v33, %v575_v37  ;;  %v666_v42 = vpop.permute.xlu1 %665  ;;  %v642_v43 = vpop.permute.xlu0 %641  ;;  %v657_v14 = vadd.f32 %v655_v60, %v649_v59  ;;  %v1895_v60 = vld [vmem:[%s460_s17 + $0x8] sm:$0xff] }
  0xb2   : > { %v644_v46 = vsel %vm569_vm3, %v1533_v38, %v642_v43  ;;  %v673_v58 = vsel %vm618_vm4, %v666_v42, %v1529_v49  ;;  %v522_v43 = vld [vmem:[%s450_s14] sm:$0xff] }
  0xb3   : > { %v626_v53 = vadd.f32 %v624_v48, %v594_v41  ;;  %v648_v54 = vmul.f32 %v1819_v44, %v644_v46  ;;  %v677_v5 = vmul.f32 %v1839_v57, %v673_v58  ;;  %v1888_v49 = vld [vmem:[%s460_s17] sm:$0xff]  ;;  %s475_s17 = scalar_lea.vmem %s2225_s7, %s1687_s21 }
  0xb5   : > { %v672_v55 = vpop.permute.xlu1 %671  ;;  %v670_v56 = vpop.permute.xlu0 %669  ;;  %v650_v6 = vadd.f32 %v648_v54, %v626_v53  ;;  %v679_v19 = vadd.f32 %v677_v5, %v657_v14  ;;  %v775_v54 = vstv %s1870_s30  ;;  %s790_s30 = ssub.f32 0.0, %s1971_s19 }
  0xb6   : > { %v674_v12 = vsel %vm618_vm4, %v670_v56, %v672_v55  ;;  %v523_v55 = vld [vmem:[%s450_s14 + $0x8] sm:$0xff]  ;;  %s2075_s14 = sld [smem:[#allocation3 + $0x7]] }
  0xb7   : > { %v658_v20 = vadd.f32 %v656_v7, %v650_v6  ;;  %v678_v17 = vmul.f32 %v1839_v57, %v674_v12  ;;  %v1891_v56 = vld [vmem:[#allocation2 + $0x8] sm:$0x80] }
  0xb8   : > { %v826_v0 = vrot.slane %v1891_v56, 7 }
  0xb9   : > { %v707_v8 = vpop.permute.xlu0 %706  ;;  %v709_v10 = vpop.permute.xlu1 %708  ;;  %v680_v30 = vadd.f32 %v678_v17, %v658_v20  ;;  %v946_v17 = vsel %vm693_vm2, %v1703_v11, %v945_v18 }
  0xba   : > { %v712_v13 = vsel %vm569_vm3, %v1534_v61, %v707_v8 }
  0xbb   : > { %v716_v15 = vmul.f32 %v1847_v62, %v712_v13 }
  0xbd   : > { %v711_v22 = vpop.permute.xlu0 %710  ;;  %v753_v23 = vpop.permute.xlu1 %752  ;;  %v718_v26 = vadd.f32 %v716_v15, %v679_v19 }
  0xbe   : > { %v713_v25 = vsel %vm569_vm3, %v709_v10, %v711_v22  ;;  %v980_v10 = vld [vmem:[#allocation2 + $0x28] sm:$0xfe]  ;;  %v1933_v22 = vld [vmem:[#allocation2 + $0x50] sm:$0x1] }
  0xbf   : > { %v717_v27 = vmul.f32 %v1847_v62, %v713_v25  ;;  %v737_v35 = vadd.f32 %v732_v29, %v718_v26  ;;  %v984_v12 = vrot.slane %v980_v10, 1  ;;  %v981_v25 = vld [vmem:[#allocation2 + $0x58] sm:$0x1]  ;;  %v1016_v29 = vld [vmem:[#allocation2] sm:$0x80] }
  0xc0   : > { %v987_v28 = vrot.slane %v981_v25, 1  ;;  %v1979_v10 = vld [vmem:[%s470_s23] sm:$0xff] }
  0xc1   : > { %v755_v32 = vpop.permute.xlu0 %754  ;;  %v719_v34 = vadd.f32 %v717_v27, %v680_v30  ;;  %v757_v38 = vpop.permute.xlu1 %756  ;;  %v986_v13 = vsel %vm693_vm2, %v984_v12, %v1703_v11  ;;  %v947_v27 = vrot.slane %v1933_v22, 1  ;;  %v1020_v30 = vld [vmem:[#allocation2 + $0x30] sm:$0x7f]  ;;  %v785_v12 = vstv %s1969_s18 }
  0xc2   : > { %v760_v33 = vsel %vm618_vm4, %v753_v23, %v755_v32  ;;  %v1067_v32 = vld [vmem:[#allocation2 + $0x10] sm:$0x80]  ;;  %v786_v18 = vmul.f32 %v785_v12, %v1979_v10 }
  0xc3   : > { %v764_v37 = vmul.f32 %v1867_v36, %v760_v33  ;;  %v738_v47 = vadd.f32 %v734_v40, %v719_v34  ;;  %v1069_v33 = vld [vmem:[#allocation2 + $0x40] sm:$0x7f]  ;;  %v1073_v40 = vrot.slane %v1067_v32, 7 }
  0xc5   : > { %v766_v41 = vadd.f32 %v764_v37, %v737_v35  ;;  %v759_v42 = vpop.permute.xlu0 %758  ;;  %v1028_v35 = vrot.slane %v1016_v29, 7  ;;  %v1034_v37 = vrot.slane %v1020_v30, 7  ;;  %v2006_v29 = vmul.f32 %v1789_v9, %v1933_v22 }
  0xc6   : > { %v761_v45 = vsel %vm618_vm4, %v757_v38, %v759_v42  ;;  %v988_v38 = vsel %vm693_vm2, %v1703_v11, %v987_v28  ;;  %v1136_v42 = vld [vmem:[#allocation2 + $0x18] sm:$0xfe]  ;;  %v778_v28 = vstv %s1977_s24  ;;  %s490_s24 = scalar_lea.vmem %s2228_s10, %s1687_s21 }
  0xc7   : > { %v769_v46 = vmul.f32 %v1878_v39, %v766_v41  ;;  %v765_v48 = vmul.f32 %v1867_v36, %v761_v45  ;;  %v1076_v41 = vrot.slane %v1069_v33, 7  ;;  %v1035_v45 = vsel %vm550_vm1, %v1694_v2, %v1034_v37 }
  0xc8   : > { %v2009_v33 = vadd.f32 %v786_v18, %v1696_v3  ;;  %v791_v37 = vstv %s790_s30 }
  0xc9   : > { %v771_v52 = vadd.f32 %v769_v46, %v522_v43  ;;  %v767_v53 = vadd.f32 %v765_v48, %v738_v47  ;;  %v1030_v43 = vsel %vm550_vm1, %v1028_v35, %v1694_v2  ;;  %v1075_v46 = vsel %vm550_vm1, %v1073_v40, %v1694_v2 }
  0xca   : > { %v1077_v47 = vsel %vm550_vm1, %v1694_v2, %v1076_v41  ;;  %v1144_v48 = vrot.slane %v1136_v42, 1  ;;  %v876_v2 = vpop.permute.xlu0 %875 }
  0xcb   : > { %v773_v58 = vsub.f32 %v771_v52, %v1888_v49  ;;  %v770_v59 = vmul.f32 %v1878_v39, %v767_v53  ;;  %v1550_v52 = vpack.i.bf16 %v1593_v1, %v1035_v45  ;;  %v1555_v53 = vpack.i.bf16 %v1593_v1, %v1077_v47 }
  0xcd   : > { %v1897_v61 = vmul.f32 %v775_v54, %v773_v58  ;;  %v772_v63 = vadd.f32 %v770_v59, %v523_v55  ;;  %v834_v58 = vpop.permute.xlu1 %833 }
  0xce   : > { %v1965_v59 = vpop.permute.xlu0 %1541 }
  0xcf   : > { %809 = vst [vmem:[#allocation2 + $0x20] sm:$0xff] %v1897_v61  ;;  %v774_v5 = vsub.f32 %v772_v63, %v1895_v60  ;;  %915 = vrot.lane.b32.xlu0 %v1897_v61, %s1595_s26  ;;  %895 = vrot.lane.b32.xlu1 %v1897_v61, %s1594_s25  ;;  %v827_v6 = vrot.slane %v1897_v61, 7  ;;  %v909_v42 = vmul.f32 %v1827_v50, %v1897_v61 }
  0xd1   : > { %v1907_v7 = vmul.f32 %v775_v54, %v774_v5  ;;  %v828_v8 = vsel %vm550_vm1, %v826_v0, %v827_v6  ;;  %v1146_v54 = vsel %vm693_vm2, %v1144_v48, %v1703_v11  ;;  %v1537_v63 = vpop.permute.xlu1 %1536 }
  0xd2   : > { %v1560_v55 = vpack.i.bf16 %v1146_v54, %v1593_v1  ;;  %v1967_v0 = vpop.permute.xlu0 %1546  ;;  %v1539_v30 = vunpack.i.h.bf16 %v1537_v63  ;;  %v1538_v32 = vunpack.i.l.bf16 %v1537_v63 }
  0xd3   : > { %810 = vst [vmem:[#allocation2 + $0x38] sm:$0xff] %v1907_v7  ;;  %899 = vrot.lane.b32.xlu1 %v1907_v7, %s1594_s25  ;;  %835 = vrot.lane.b32.xlu0 %v828_v8, %s1594_s25  ;;  %v943_v23 = vrot.slane %v1907_v7, 1  ;;  %v1549_v40 = vunpack.i.h.bf16 %v1967_v0 }
  0xd5   : > { %v948_v34 = vsel %vm693_vm2, %v943_v23, %v947_v27  ;;  %v2001_v27 = vld [vmem:[%s465_s29] sm:$0xff] }
  0xd6   : > { %v1925_v19 = vld [vmem:[#allocation2 + $0x20] sm:$0xfe]  ;;  %v779_v22 = vmul.f32 %v778_v28, %v2001_v27 }
  0xd7   : > { %919 = vrot.lane.b32.xlu1 %v1907_v7, %s1595_s26  ;;  %v942_v20 = vrot.slane %v1925_v19, 1 }
  0xd9   : > { %v944_v26 = vsel %vm693_vm2, %v942_v20, %v943_v23 }
  0xda   : > { %v1918_v14 = vld [vmem:[#allocation2 + $0x38] sm:$0x7f] }
  0xdb   : > { %v831_v15 = vrot.slane %v1918_v14, 7  ;;  %991 = vrot.lane.b32.xlu1 %v986_v13, %s1595_s26  ;;  %v847_v13 = vmul.f32 %v1832_v51, %v1891_v56  ;;  %v849_v56 = vmul.f32 %v1832_v51, %v1918_v14 }
  0xdd   : > { %v832_v16 = vsel %vm550_vm1, %v827_v6, %v831_v15  ;;  %v848_v15 = vmul.f32 %v1832_v51, %v1897_v61  ;;  %v853_v23 = vrot.slane %v847_v13, 7  ;;  %v965_v13 = vmul.f32 %v1789_v9, %v1925_v19 }
  0xde   : > { %839 = vrot.lane.b32.xlu0 %v832_v16, %s1594_s25 }
  0xdf   : > { %873 = vrot.lane.b32.xlu1 %v828_v8, %s1595_s26  ;;  %v854_v25 = vrot.slane %v848_v15, 7 }
  0xe1   : > { %v855_v45 = vsel %vm550_vm1, %v853_v23, %v854_v25 }
  0xe2   : > { %921 = vrot.lane.b32.xlu0 %v1593_v1, %s1595_s26 }
  0xe3   : > { %877 = vrot.lane.b32.xlu1 %v832_v16, %s1595_s26 }
  0xe6   : > { %953 = vrot.lane.b32.xlu0 %v946_v17, %s1594_s25  ;;  %v1995_v17 = vld [vmem:[%s470_s23 + $0x8] sm:$0xff] }
  0xe7   : > { %951 = vrot.lane.b32.xlu1 %v944_v26, %s1594_s25  ;;  %v787_v14 = vmul.f32 %v785_v12, %v1995_v17 }
  0xe9   : > { %v2035_v12 = vadd.f32 %v787_v14, %v1698_v4 }
  0xea   : > { %989 = vrot.lane.b32.xlu0 %v944_v26, %s1595_s26 }
  0xeb   : > { %955 = vrot.lane.b32.xlu1 %v948_v34, %s1594_s25 }
  0xee   : > { %993 = vrot.lane.b32.xlu0 %v948_v34, %s1595_s26  ;;  %v1544_v34 = vunpack.i.h.bf16 %v1965_v59 }
  0xef   : > { %995 = vrot.lane.b32.xlu1 %v988_v38, %s1595_s26  ;;  %v1543_v38 = vunpack.i.l.bf16 %v1965_v59 }
  0xf2   : > { %1038 = vrot.lane.b32.xlu0 %v1030_v43, %s1594_s25  ;;  %v1548_v43 = vunpack.i.l.bf16 %v1967_v0 }
  0xf3   : > { %1080 = vrot.lane.b32.xlu1 %v1075_v46, %s1595_s26  ;;  %v856_v46 = vrot.slane %v849_v56, 7 }
  0xf6   : > { %1551 = vrot.lane.b32.xlu0 %v1550_v52, %s1594_s25  ;;  %v2024_v52 = vld [vmem:[%s465_s29 + $0x8] sm:$0xff] }
  0xf7   : > { %1556 = vrot.lane.b32.xlu1 %v1555_v53, %s1595_s26 }
  0xfb   : > { %1561 = vrot.lane.b32.xlu1 %v1560_v55, %s1594_s25  ;;  %v792_v55 = vmax.f32 %v2009_v33, %v791_v37 }
 0x141   : > { %v896_v5 = vpop.permute.xlu1 %895  ;;  %v916_v6 = vpop.permute.xlu0 %915 }
 0x142   : > { %v901_v53 = vsel %vm569_vm3, %v1539_v30, %v896_v5  ;;  %v781_v5 = vadd.f32 %v779_v22, %v1696_v3  ;;  %v910_v30 = vmul.f32 %v1827_v50, %v1907_v7  ;;  %v923_v19 = vsel %vm618_vm4, %v916_v6, %v1544_v34 }
 0x143   : > { %v905_v18 = vmul.f32 %v1839_v57, %v901_v53  ;;  %v793_v22 = vmax.f32 %v2035_v12, %v791_v37  ;;  %v927_v6 = vmul.f32 %v1819_v44, %v923_v19  ;;  %v2062_v37 = vstv %s2028_s12 }
 0x145   : > { %v900_v8 = vpop.permute.xlu1 %899  ;;  %v836_v31 = vpop.permute.xlu0 %835 }
 0x146   : > { %v841_v20 = vsel %vm569_vm3, %v834_v58, %v836_v31  ;;  %v794_v58 = vstv %s1971_s19  ;;  %v780_v31 = vmul.f32 %v778_v28, %v2024_v52 }
 0x147   : > { %v845_v35 = vmul.f32 %v1867_v36, %v841_v20  ;;  %v857_v20 = vsel %vm550_vm1, %v854_v25, %v856_v46  ;;  %v971_v25 = vrot.slane %v965_v13, 1  ;;  %v783_v46 = vmax.f32 %v781_v5, 0.0 }
 0x148   : > { %v974_v13 = vrot.slane %v2006_v29, 1 }
 0x149   : > { %v1986_v16 = vpop.permute.xlu1 %919  ;;  %v860_v59 = vadd.f32 %v855_v45, %v845_v35  ;;  %v795_v35 = vmin.f32 %v792_v55, %v794_v58 }
 0x14d   : > { %v1999_v26 = vpop.permute.xlu1 %991 }
 0x150   : > { %v840_v41 = vpop.permute.xlu0 %839 }
 0x151   : > { %v842_v47 = vsel %vm569_vm3, %v1538_v32, %v840_v41  ;;  %v874_v48 = vpop.permute.xlu1 %873  ;;  %v902_v32 = vsel %vm569_vm3, %v1548_v43, %v900_v8 }
 0x152   : > { %v881_v54 = vsel %vm618_vm4, %v874_v48, %v876_v2  ;;  %v846_v63 = vmul.f32 %v1867_v36, %v842_v47  ;;  %v966_v2 = vmul.f32 %v1789_v9, %v1907_v7  ;;  %v2053_v47 = vstv %s2016_s11 }
 0x153   : > { %v885_v0 = vmul.f32 %v1847_v62, %v881_v54  ;;  %v782_v48 = vadd.f32 %v780_v31, %v1698_v4  ;;  %v906_v8 = vmul.f32 %v1839_v57, %v902_v32  ;;  %v797_v54 = vsub.f32 %v2009_v33, %v795_v35 }
 0x154   : > { %v922_v15 = vpop.permute.xlu0 %921  ;;  %v861_v14 = vadd.f32 %v857_v20, %v846_v63  ;;  %v800_v31 = vmul.f32 %v2053_v47, %v783_v46 }
 0x155   : > { %v887_v23 = vadd.f32 %v885_v0, %v860_v59  ;;  %v878_v56 = vpop.permute.xlu1 %877  ;;  %v924_v53 = vsel %vm618_vm4, %v1986_v16, %v922_v15  ;;  %v796_v0 = vmin.f32 %v793_v22, %v794_v58 }
 0x156   : > { %v882_v3 = vsel %vm618_vm4, %v878_v56, %v1543_v38  ;;  %v928_v16 = vmul.f32 %v1819_v44, %v924_v53  ;;  %v805_v56 = vmul.f32 %v2062_v37, %v797_v54  ;;  %v802_v35 = vsub.f32 %v800_v31, %v2001_v27 }
 0x157   : > { %v907_v28 = vadd.f32 %v905_v18, %v887_v23  ;;  %v886_v41 = vmul.f32 %v1847_v62, %v882_v3  ;;  %v784_v18 = vmax.f32 %v782_v48, 0.0  ;;  %v798_v3 = vsub.f32 %v2035_v12, %v796_v0 }
 0x158   : > { %v954_v45 = vpop.permute.xlu0 %953  ;;  %v807_v22 = vsub.f32 %v805_v56, %v1979_v10 }
 0x159   : > { %v888_v34 = vadd.f32 %v886_v41, %v861_v14  ;;  %v952_v38 = vpop.permute.xlu1 %951  ;;  %v911_v43 = vadd.f32 %v909_v42, %v907_v28  ;;  %v972_v42 = vrot.slane %v966_v2, 1  ;;  %v801_v28 = vmul.f32 %v2053_v47, %v784_v18 }
 0x15a   : > { %v957_v55 = vsel %vm569_vm3, %v1549_v40, %v952_v38  ;;  %v806_v12 = vmul.f32 %v2062_v37, %v798_v3  ;;  %v1017_v38 = vld [vmem:[#allocation2 + $0x8] sm:$0x80] }
 0x15b   : > { %v908_v59 = vadd.f32 %v906_v8, %v888_v34  ;;  %v929_v63 = vadd.f32 %v927_v6, %v911_v43  ;;  %v961_v4 = vmul.f32 %v1806_v24, %v957_v55  ;;  %v973_v58 = vsel %vm693_vm2, %v971_v25, %v972_v42  ;;  %v2091_v55 = vld [vmem:[#allocation2 + $0x50] sm:$0x1] }
 0x15c   : > { %v990_v5 = vpop.permute.xlu0 %989  ;;  %v975_v25 = vsel %vm693_vm2, %v972_v42, %v974_v13  ;;  %v803_v8 = vsub.f32 %v801_v28, %v2024_v52  ;;  %v1011_v43 = vstv %s2075_s14  ;;  %v808_v10 = vsub.f32 %v806_v12, %v1995_v17 }
 0x15d   : > { %v997_v33 = vsel %vm618_vm4, %v990_v5, %v1999_v26  ;;  %v963_v15 = vadd.f32 %v961_v4, %v929_v63  ;;  %v956_v20 = vpop.permute.xlu1 %955  ;;  %v912_v40 = vadd.f32 %v910_v30, %v908_v59  ;;  %v1052_v59 = vmul.f32 %v1789_v9, %v1017_v38 }
 0x15e   : > { %v1001_v23 = vmul.f32 %v1800_v21, %v997_v33  ;;  %v958_v29 = vsel %vm569_vm3, %v954_v45, %v956_v20  ;;  %v1031_v4 = vrot.slane %v1017_v38, 7  ;;  %v1172_v0 = vmul.f32 %v1832_v51, %v2091_v55 }
 0x15f   : > { %v978_v2 = vadd.f32 %v973_v58, %v963_v15  ;;  %v930_v19 = vadd.f32 %v928_v16, %v912_v40  ;;  %v962_v32 = vmul.f32 %v1806_v24, %v958_v29  ;;  %v1058_v42 = vrot.slane %v1052_v59, 7  ;;  %v1185_v40 = vld [vmem:[#allocation2 + $0x28] sm:$0xfe] }
 0x160   : > { %v994_v26 = vpop.permute.xlu0 %993 }
 0x161   : > { %v1003_v30 = vadd.f32 %v1001_v23, %v978_v2  ;;  %v964_v14 = vadd.f32 %v962_v32, %v930_v19  ;;  %v996_v41 = vpop.permute.xlu1 %995  ;;  %v1179_v2 = vrot.slane %v1172_v0, 1  ;;  %v1189_v19 = vrot.slane %v1185_v40, 1 }
 0x162   : > { %v998_v45 = vsel %vm618_vm4, %v994_v26, %v996_v41 }
 0x163   : > { %v1005_v46 = vmul.f32 %v1003_v30, %v1878_v39  ;;  %v979_v48 = vadd.f32 %v975_v25, %v964_v14  ;;  %v1002_v27 = vmul.f32 %v1800_v21, %v998_v45  ;;  %v1191_v14 = vsel %vm693_vm2, %v1189_v19, %v1703_v11 }
 0x164   : > { %v1039_v59 = vpop.permute.xlu0 %1038 }
 0x165   : > { %v1007_v6 = vadd.f32 %v1005_v46, %v802_v35  ;;  %v1004_v34 = vadd.f32 %v1002_v27, %v979_v48  ;;  %v1138_v46 = vld [vmem:[#allocation2 + $0x48] sm:$0x1] }
 0x166   : > { %v1150_v48 = vrot.slane %v1138_v46, 1 }
 0x167   : > { %v1009_v53 = vadd.f32 %v1007_v6, %v807_v22  ;;  %v1006_v54 = vmul.f32 %v1004_v34, %v1878_v39  ;;  %v1186_v34 = vld [vmem:[#allocation2 + $0x58] sm:$0x1] }
 0x168   : > { %v1151_v6 = vsel %vm693_vm2, %v1703_v11, %v1150_v48 }
 0x169   : > { %v1008_v63 = vadd.f32 %v1006_v54, %v803_v8  ;;  %v2098_v52 = vmul.f32 %v1011_v43, %v1009_v53  ;;  %v1192_v53 = vrot.slane %v1186_v34, 1  ;;  %v1081_v54 = vpop.permute.xlu1 %1080 }
 0x16b   : > { %v1010_v17 = vadd.f32 %v1008_v63, %v808_v10  ;;  %1014 = vst [vmem:[#allocation2 + $0x20] sm:$0xff] %v2098_v52  ;;  %v1216_v13 = vmul.f32 %v2098_v52, %v2053_v47  ;;  %v1220_v5 = vmul.f32 %v2098_v52, %v2062_v37  ;;  %1224 = vst [vmem:[%s475_s17] sm:$0xff] %v2098_v52  ;;  %1120 = vrot.lane.b32.xlu1 %v2098_v52, %s1595_s26 }
 0x16c   : > { %1100 = vrot.lane.b32.xlu0 %v2098_v52, %s1594_s25  ;;  %v1032_v31 = vrot.slane %v2098_v52, 7  ;;  %v1053_v18 = vmul.f32 %v1789_v9, %v2098_v52 }
 0x16d   : > { %v2123_v16 = vmul.f32 %v1011_v43, %v1010_v17  ;;  %v1218_v33 = vsub.f32 %v1216_v13, %v802_v35  ;;  %v1222_v15 = vsub.f32 %v1220_v5, %v807_v22  ;;  %v1152_v43 = vrot.slane %v2091_v55, 1  ;;  %v1557_v63 = vpop.permute.xlu1 %1556  ;;  %v1552_v55 = vpop.permute.xlu0 %1551 }
 0x16e   : > { %v1033_v20 = vsel %vm550_vm1, %v1031_v4, %v1032_v31  ;;  %v1059_v23 = vrot.slane %v1053_v18, 7 }
 0x16f   : > { %1015 = vst [vmem:[#allocation2 + $0x38] sm:$0xff] %v2123_v16  ;;  %v1217_v56 = vmul.f32 %v2123_v16, %v2053_v47  ;;  %v1221_v58 = vmul.f32 %v2123_v16, %v2062_v37  ;;  %1225 = vst [vmem:[%s475_s17 + $0x8] sm:$0xff] %v2123_v16  ;;  %1040 = vrot.lane.b32.xlu1 %v1033_v20, %s1594_s25  ;;  %v1171_v29 = vmul.f32 %v1832_v51, %v2123_v16 }
 0x170   : > { %1228 = vst [vmem:[%s485_s20] sm:$0xff] %v1218_v33  ;;  %1230 = vst [vmem:[%s490_s24] sm:$0xff] %v1222_v15  ;;  %1104 = vrot.lane.b32.xlu0 %v2123_v16, %s1594_s25  ;;  %v2138_v32 = vsel %vm550_vm1, %v1058_v42, %v1059_v23  ;;  %v1553_v33 = vunpack.i.l.bf16 %v1552_v55  ;;  %v1554_v15 = vunpack.i.h.bf16 %v1552_v55 }
 0x171   : > { %v1219_v47 = vsub.f32 %v1217_v56, %v803_v8  ;;  %v1223_v3 = vsub.f32 %v1221_v58, %v808_v10  ;;  %v1177_v37 = vrot.slane %v1171_v29, 1  ;;  %v1148_v8 = vrot.slane %v2123_v16, 1  ;;  %v1562_v4 = vpop.permute.xlu1 %1561 }
 0x172   : > { %v1137_v26 = vld [vmem:[#allocation2 + $0x20] sm:$0xfe]  ;;  %v1193_v10 = vsel %vm693_vm2, %v1703_v11, %v1192_v53  ;;  %v1559_v56 = vunpack.i.h.bf16 %v1557_v63  ;;  %v1563_v58 = vunpack.i.l.bf16 %v1562_v4 }
 0x173   : > { %1229 = vst [vmem:[%s485_s20 + $0x8] sm:$0xff] %v1219_v47  ;;  %1231 = vst [vmem:[%s490_s24 + $0x8] sm:$0xff] %v1223_v3  ;;  %v1170_v35 = vmul.f32 %v1832_v51, %v1137_v26  ;;  %v2144_v30 = vsel %vm693_vm2, %v1177_v37, %v1179_v2 }
 0x174   : > { %1124 = vrot.lane.b32.xlu0 %v2123_v16, %s1595_s26 }
 0x175   : > { %v1176_v28 = vrot.slane %v1170_v35, 1 }
 0x176   : > { %v1021_v41 = vld [vmem:[#allocation2 + $0x38] sm:$0x7f] }
 0x177   : > { %v1036_v22 = vrot.slane %v1021_v41, 7  ;;  %v1054_v25 = vmul.f32 %v1789_v9, %v1021_v41  ;;  %v2151_v45 = vsel %vm693_vm2, %v1176_v28, %v1177_v37  ;;  %v1147_v9 = vrot.slane %v1137_v26, 1 }
 0x178   : > { %1196 = vrot.lane.b32.xlu0 %v1191_v14, %s1595_s26  ;;  %v1558_v37 = vunpack.i.l.bf16 %v1557_v63 }
 0x179   : > { %v1037_v12 = vsel %vm550_vm1, %v1032_v31, %v1036_v22  ;;  %v1061_v51 = vrot.slane %v1054_v25, 7  ;;  %v1149_v38 = vsel %vm693_vm2, %v1147_v9, %v1148_v8 }
 0x17a   : > { %1044 = vrot.lane.b32.xlu1 %v1037_v12, %s1594_s25 }
 0x17b   : > { %v1062_v27 = vsel %vm550_vm1, %v1059_v23, %v1061_v51  ;;  %v1564_v51 = vunpack.i.h.bf16 %v1562_v4 }
 0x17c   : > { %1078 = vrot.lane.b32.xlu0 %v1033_v20, %s1595_s26 }
 0x17e   : > { %1126 = vrot.lane.b32.xlu1 %v1593_v1, %s1595_s26  ;;  %v1153_v1 = vsel %vm693_vm2, %v1148_v8, %v1152_v43 }
 0x180   : > { %1082 = vrot.lane.b32.xlu0 %v1037_v12, %s1595_s26 }
 0x182   : > { %1158 = vrot.lane.b32.xlu1 %v1151_v6, %s1594_s25 }
 0x184   : > { %1156 = vrot.lane.b32.xlu0 %v1149_v38, %s1594_s25 }
 0x186   : > { %1194 = vrot.lane.b32.xlu1 %v1149_v38, %s1595_s26 }
 0x188   : > { %1160 = vrot.lane.b32.xlu0 %v1153_v1, %s1594_s25 }
 0x18a   : > { %1198 = vrot.lane.b32.xlu1 %v1153_v1, %s1595_s26 }
 0x18c   : > { %1200 = vrot.lane.b32.xlu0 %v1193_v10, %s1595_s26 }
 0x1dd   : > { %v1121_v17 = vpop.permute.xlu1 %1120 }
 0x1de   : > { %v1101_v0 = vpop.permute.xlu0 %1100  ;;  %v1128_v41 = vsel %vm618_vm4, %v1121_v17, %v1559_v56 }
 0x1df   : > { %v1106_v29 = vsel %vm569_vm3, %v1554_v15, %v1101_v0  ;;  %v1132_v9 = vmul.f32 %v1839_v57, %v1128_v41 }
 0x1e0   : > { %v1110_v35 = vmul.f32 %v1819_v44, %v1106_v29 }
 0x1e1   : > { %v1041_v5 = vpop.permute.xlu1 %1040 }
 0x1e2   : > { %v1105_v13 = vpop.permute.xlu0 %1104  ;;  %v1046_v42 = vsel %vm569_vm3, %v1039_v59, %v1041_v5 }
 0x1e3   : > { %v1050_v11 = vmul.f32 %v1800_v21, %v1046_v42  ;;  %v1107_v22 = vsel %vm569_vm3, %v1563_v58, %v1105_v13 }
 0x1e4   : > { %v1111_v6 = vmul.f32 %v1819_v44, %v1107_v22 }
 0x1e5   : > { %v1065_v19 = vadd.f32 %v2138_v32, %v1050_v11 }
 0x1e6   : > { %v1125_v31 = vpop.permute.xlu0 %1124 }
 0x1ea   : > { %v1197_v18 = vpop.permute.xlu0 %1196 }
 0x1ec   : > { %v1045_v20 = vpop.permute.xlu1 %1044 }
 0x1ed   : > { %v1047_v40 = vsel %vm569_vm3, %v1553_v33, %v1045_v20 }
 0x1ee   : > { %v1079_v23 = vpop.permute.xlu0 %1078  ;;  %v1051_v47 = vmul.f32 %v1800_v21, %v1047_v40  ;;  %v1114_v21 = vmul.f32 %v1827_v50, %v2098_v52  ;;  %v1115_v52 = vmul.f32 %v1827_v50, %v2123_v16 }
 0x1ef   : > { %v1086_v2 = vsel %vm618_vm4, %v1079_v23, %v1081_v54 }
 0x1f0   : > { %v1090_v3 = vmul.f32 %v1806_v24, %v1086_v2  ;;  %v1127_v26 = vpop.permute.xlu1 %1126  ;;  %v1066_v46 = vadd.f32 %v1062_v27, %v1051_v47 }
 0x1f1   : > { %v1129_v43 = vsel %vm618_vm4, %v1125_v31, %v1127_v26 }
 0x1f2   : > { %v1092_v14 = vadd.f32 %v1090_v3, %v1065_v19  ;;  %v1083_v28 = vpop.permute.xlu0 %1082  ;;  %v1133_v54 = vmul.f32 %v1839_v57, %v1129_v43 }
 0x1f3   : > { %v1087_v25 = vsel %vm618_vm4, %v1083_v28, %v1558_v37 }
 0x1f4   : > { %v1112_v12 = vadd.f32 %v1110_v35, %v1092_v14  ;;  %v1091_v32 = vmul.f32 %v1806_v24, %v1087_v25  ;;  %v1159_v48 = vpop.permute.xlu1 %1158 }
 0x1f6   : > { %v1093_v8 = vadd.f32 %v1091_v32, %v1066_v46  ;;  %v1157_v34 = vpop.permute.xlu0 %1156  ;;  %v1116_v38 = vadd.f32 %v1114_v21, %v1112_v12 }
 0x1f7   : > { %v1162_v53 = vsel %vm569_vm3, %v1564_v51, %v1157_v34 }
 0x1f8   : > { %v1113_v27 = vadd.f32 %v1111_v6, %v1093_v8  ;;  %v1134_v1 = vadd.f32 %v1132_v9, %v1116_v38  ;;  %v1166_v24 = vmul.f32 %v1847_v62, %v1162_v53  ;;  %v1195_v10 = vpop.permute.xlu1 %1194 }
 0x1f9   : > { %v1202_v59 = vsel %vm618_vm4, %v1195_v10, %v1197_v18 }
 0x1fa   : > { %v1168_v44 = vadd.f32 %v1166_v24, %v1134_v1  ;;  %v1161_v63 = vpop.permute.xlu0 %1160  ;;  %v1117_v55 = vadd.f32 %v1115_v52, %v1113_v27  ;;  %v1206_v4 = vmul.f32 %v1867_v36, %v1202_v59 }
 0x1fb   : > { %v1163_v0 = vsel %vm569_vm3, %v1159_v48, %v1161_v63 }
 0x1fc   : > { %v1183_v17 = vadd.f32 %v2151_v45, %v1168_v44  ;;  %v1135_v13 = vadd.f32 %v1133_v54, %v1117_v55  ;;  %v1167_v5 = vmul.f32 %v1847_v62, %v1163_v0  ;;  %v1199_v31 = vpop.permute.xlu1 %1198 }
 0x1fe   : > { %v1208_v50 = vadd.f32 %v1206_v4, %v1183_v17  ;;  %v1169_v16 = vadd.f32 %v1167_v5, %v1135_v13  ;;  %v1201_v42 = vpop.permute.xlu0 %1200 }
 0x1ff   : > { %v1203_v57 = vsel %vm618_vm4, %v1199_v31, %v1201_v42 }
 0x200   : > { %v1210_v18 = vsub.f32 %v1208_v50, %v1897_v61  ;;  %v1184_v33 = vadd.f32 %v2144_v30, %v1169_v16  ;;  %v1207_v11 = vmul.f32 %v1867_v36, %v1203_v57 }
 0x202   : > { %v1212_v15 = vmul.f32 %v1210_v18, %v1878_v39  ;;  %v1209_v20 = vadd.f32 %v1207_v11, %v1184_v33 }
 0x204   : > { %v1214_v62 = vadd.f32 %v1212_v15, %v1888_v49  ;;  %v1211_v45 = vsub.f32 %v1209_v20, %v1907_v7 }
 0x206   : > { %1226 = vst [vmem:[%s480_s27] sm:$0xff] %v1214_v62  ;;  %v1213_v40 = vmul.f32 %v1211_v45, %v1878_v39 }
 0x208   : > { %v1215_v61 = vadd.f32 %v1213_v40, %v1895_v60 }
 0x20a   : > { %1227 = vst [vmem:[%s480_s27 + $0x8] sm:$0xff] %v1215_v61 }
 0x20b PF: > { %s22_s13 = sadd.s32 1, %s1590_s13  }
 0x20c   : > { %p19_p1 = scmp.ge.s32.totalorder %s22_s13, 4  }
 0x20e   :  { %21 = sbr.rel (!%p19_p1) target bundleno = 1 (0x1), region = 133 }
 0x215   :  { %1301 = vsyncpa [#allocation4], 1 }
 0x216   :  { %1303 = vsyncpa [#allocation4 + $0x1], 1 }

</bundles_post_ra>
